<compile_context>
chip_gen: v6e
topology: v6e:2x2x1
jax: 0.10.0
libtpu: 0.0.40
codegen_flags: <defaults>
</compile_context>

<pallas_src>
import functools

import jax
import jax.numpy as jnp
from jax.experimental import pallas as pl
from jax.experimental.pallas import tpu as pltpu


def _round_up(x, m):
    return (x + m - 1) // m * m


# ----------------------------------------------------------------------------
# Fused Pallas kernel: one image (grid step) per invocation.
# ----------------------------------------------------------------------------
def _fused_resblock_kernel(xpad_ref, w1_ref, w2_ref, s1_ref, sh1_ref,
                           s2_ref, sh2_ref, fcw_ref, fcb_ref, o_ref,
                           y1pad_ref, *, h, w):
    """conv1->bn1->relu->conv2->bn2->+identity->relu->GAP->FC for one image.

    xpad_ref : (1, h+2, w+2, cp)  f32   spatially zero-padded, channel-padded
    w1/w2    : (3, 3, cp, cp)     bf16  conv taps, (ky, kx, cin, cout)
    s*/sh*   : (1, cp)            f32   folded BN scale / shift
    fcw      : (cp, ncp)          bf16  FC weight (padded)
    fcb      : (1, ncp)           f32   FC bias (padded)
    o_ref    : (1, 1, ncp)        f32   logits (padded classes)
    y1pad_ref: (h+2, w+2, cp)     f32   VMEM scratch for conv2's halo
    """
    cp = xpad_ref.shape[-1]
    hw = h * w

    def conv3x3(load_patch, w_ref):
        # 3x3 / stride-1 conv as 9 shifted-slice matmuls on the MXU.
        # bf16 operands, f32 accumulation; affine epilogue applied by caller.
        acc = jnp.zeros((hw, cp), jnp.float32)
        for ky in range(3):
            for kx in range(3):
                patch = load_patch(ky, kx).reshape(hw, cp)
                acc = acc + jnp.dot(patch.astype(jnp.bfloat16),
                                    w_ref[ky, kx, :, :],
                                    preferred_element_type=jnp.float32)
        return acc

    # conv1 -> bn1 (folded) -> relu
    acc1 = conv3x3(lambda ky, kx: xpad_ref[0, ky:ky + h, kx:kx + w, :], w1_ref)
    y1 = jnp.maximum(acc1 * s1_ref[...] + sh1_ref[...], 0.0)        # (hw, cp)

    # Stage y1 with a zero spatial halo entirely in VMEM (no HBM im2col).
    y1pad_ref[...] = jnp.zeros_like(y1pad_ref)
    y1pad_ref[1:h + 1, 1:w + 1, :] = y1.reshape(h, w, cp)

    # conv2 -> bn2 -> + identity (f32) -> relu
    acc2 = conv3x3(lambda ky, kx: y1pad_ref[ky:ky + h, kx:kx + w, :], w2_ref)
    identity = xpad_ref[0, 1:h + 1, 1:w + 1, :].reshape(hw, cp)     # f32
    y2 = jnp.maximum(acc2 * s2_ref[...] + sh2_ref[...] + identity, 0.0)

    # Global average pool: channels on the 128-lane axis, reduce over rows.
    pooled = jnp.mean(y2, axis=0, keepdims=True)                    # (1, cp)

    # FC head on the MXU (lane-dense, class-padded output).
    logits = jnp.dot(pooled.astype(jnp.bfloat16), fcw_ref[...],
                     preferred_element_type=jnp.float32) + fcb_ref[...]
    o_ref[...] = logits[None]                                       # (1,1,ncp)


# ----------------------------------------------------------------------------
# Wrapper: layout transforms, padding, BN folding, pallas_call.
# ----------------------------------------------------------------------------
def forward_pallas(x_nchw, p, num_classes):
    n, c, h, w = x_nchw.shape
    cp = _round_up(c, 128)              # lane-pad channels
    ncp = _round_up(num_classes, 128)   # lane-pad classes

    # NCHW -> NHWC, +1 spatial halo for conv1, channel-pad to 128 lanes.
    x_nhwc = jnp.transpose(x_nchw, (0, 2, 3, 1)).astype(jnp.float32)
    xpad = jnp.pad(x_nhwc, ((0, 0), (1, 1), (1, 1), (0, cp - c)))

    def conv_w_taps(wt):
        # PyTorch OIHW (cout, cin, 3, 3) -> (3, 3, cin_pad, cout_pad), bf16.
        t = jnp.transpose(wt, (2, 3, 1, 0))
        t = jnp.pad(t, ((0, 0), (0, 0), (0, cp - c), (0, cp - c)))
        return t.astype(jnp.bfloat16)

    def bn_fold(g, b, m, v, eps=1e-5):
        s = g / jnp.sqrt(v + eps)
        sh = b - m * s
        s = jnp.pad(s, (0, cp - c), constant_values=1.0)
        sh = jnp.pad(sh, (0, cp - c))
        return s[None, :].astype(jnp.float32), sh[None, :].astype(jnp.float32)

    w1 = conv_w_taps(p["w1"])
    w2 = conv_w_taps(p["w2"])
    s1, sh1 = bn_fold(p["g1"], p["b1"], p["m1"], p["v1"])
    s2, sh2 = bn_fold(p["g2"], p["b2"], p["m2"], p["v2"])
    fcw = jnp.pad(p["fc_w"],
                  ((0, cp - c), (0, ncp - num_classes))).astype(jnp.bfloat16)
    fcb = jnp.pad(p["fc_b"], (0, ncp - num_classes))[None, :].astype(jnp.float32)

    kern = functools.partial(_fused_resblock_kernel, h=h, w=w)
    const4 = lambda b: (0, 0, 0, 0)     # weights stay VMEM-resident across grid
    const2 = lambda b: (0, 0)

    out = pl.pallas_call(
        kern,
        out_shape=jax.ShapeDtypeStruct((n, 1, ncp), jnp.float32),
        grid=(n,),
        in_specs=[
            pl.BlockSpec((1, h + 2, w + 2, cp), lambda b: (b, 0, 0, 0)),
            pl.BlockSpec((3, 3, cp, cp), const4),
            pl.BlockSpec((3, 3, cp, cp), const4),
            pl.BlockSpec((1, cp), const2),
            pl.BlockSpec((1, cp), const2),
            pl.BlockSpec((1, cp), const2),
            pl.BlockSpec((1, cp), const2),
            pl.BlockSpec((cp, ncp), const2),
            pl.BlockSpec((1, ncp), const2),
        ],
        out_specs=pl.BlockSpec((1, 1, ncp), lambda b: (b, 0, 0)),
        scratch_shapes=[pltpu.VMEM((h + 2, w + 2, cp), jnp.float32)],
        compiler_params=pltpu.CompilerParams(
            dimension_semantics=("parallel",),
            vmem_limit_bytes=32 * 1024 * 1024),
    )(xpad, w1, w2, s1, sh1, s2, sh2, fcw, fcb)

    return out[:, 0, :num_classes]


# ----------------------------------------------------------------------------
# Pure-JAX f32 reference (mirrors the PyTorch BasicBlock + GAP + FC).
# ----------------------------------------------------------------------------
def forward_reference(x_nchw, p):
    def conv3x3(x, wt):
        return jax.lax.conv_general_dilated(
            x, wt, (1, 1), ((1, 1), (1, 1)),
            dimension_numbers=("NCHW", "OIHW", "NCHW"))

    def bn(x, g, b, m, v, eps=1e-5):
        s = g / jnp.sqrt(v + eps)
        return x * s[None, :, None, None] + (b - m * s)[None, :, None, None]

    out = jax.nn.relu(bn(conv3x3(x_nchw, p["w1"]),
                         p["g1"], p["b1"], p["m1"], p["v1"]))
    out = bn(conv3x3(out, p["w2"]), p["g2"], p["b2"], p["m2"], p["v2"])
    out = jax.nn.relu(out + x_nchw)
    pooled = jnp.mean(out, axis=(2, 3))
    return pooled @ p["fc_w"] + p["fc_b"]


# ----------------------------------------------------------------------------
if __name__ == "__main__":
    key = jax.random.PRNGKey(0)
    N, C, H, W = 2, 8, 8, 8          # small synthetic feature-map shapes
    NUM_CLASSES = 10

    ks = jax.random.split(key, 12)
    features = jax.random.normal(ks[0], (N, C, H, W), jnp.float32)

    params = {
        # conv1 / conv2: (Cout, Cin, 3, 3), PyTorch OIHW
        "w1": 0.1 * jax.random.normal(ks[1], (C, C, 3, 3), jnp.float32),
        "w2": 0.1 * jax.random.normal(ks[2], (C, C, 3, 3), jnp.float32),
        # batchnorm (eval mode) params
        "g1": 1.0 + 0.1 * jax.random.normal(ks[3], (C,), jnp.float32),
        "b1": 0.1 * jax.random.normal(ks[4], (C,), jnp.float32),
        "m1": 0.05 * jax.random.normal(ks[5], (C,), jnp.float32),
        "v1": 1.0 + 0.1 * jnp.abs(jax.random.normal(ks[6], (C,), jnp.float32)),
        "g2": 1.0 + 0.1 * jax.random.normal(ks[7], (C,), jnp.float32),
        "b2": 0.1 * jax.random.normal(ks[8], (C,), jnp.float32),
        "m2": 0.05 * jax.random.normal(ks[9], (C,), jnp.float32),
        "v2": 1.0 + 0.1 * jnp.abs(jax.random.normal(ks[10], (C,), jnp.float32)),
        # fc head
        "fc_w": 0.1 * jax.random.normal(ks[11], (C, NUM_CLASSES), jnp.float32),
        "fc_b": jnp.linspace(-0.5, 0.5, NUM_CLASSES, dtype=jnp.float32),
    }

    out = forward_pallas(features, params, NUM_CLASSES)
    out = jax.block_until_ready(out)

    ref = forward_reference(features, params)
    assert out.shape == (N, NUM_CLASSES)
    assert bool(jnp.all(jnp.isfinite(out)))
    # Tolerance accounts for bf16 MXU operands (f32 accumulate/epilogue) vs the
    # pure-f32 XLA reference; observed error is ~1e-3, bound set with margin.
    assert bool(jnp.allclose(out, ref, rtol=2e-2, atol=2e-2)), "mismatch vs reference"

    print("KERNEL_OK")
</pallas_src>

<mosaic_0001>
module attributes {stable_mosaic.version = 11 : i64} {
  func.func @_fused_resblock_kernel(%arg0: i32, %arg1: memref<1x10x10x128xf32, #tpu.memory_space<vmem>>, %arg2: memref<3x3x128x128xbf16, #tpu.memory_space<vmem>>, %arg3: memref<3x3x128x128xbf16, #tpu.memory_space<vmem>>, %arg4: memref<1x128xf32, #tpu.memory_space<vmem>>, %arg5: memref<1x128xf32, #tpu.memory_space<vmem>>, %arg6: memref<1x128xf32, #tpu.memory_space<vmem>>, %arg7: memref<1x128xf32, #tpu.memory_space<vmem>>, %arg8: memref<128x128xbf16, #tpu.memory_space<vmem>>, %arg9: memref<1x128xf32, #tpu.memory_space<vmem>>, %arg10: memref<1x1x128xf32, #tpu.memory_space<vmem>>, %arg11: memref<10x10x128xf32, #tpu.memory_space<vmem>>) attributes {dimension_semantics = [#tpu.dimension_semantics<parallel>], iteration_bounds = array<i64: 2>, scalar_prefetch = 0 : i64, scratch_operands = 1 : i64, tpu.core_type = #tpu.core_type<tc>, window_params = [{transform_indices = @transform_0, window_bounds = array<i64: 1, 10, 10, 128>}, {pipeline_mode = #tpu.pipeline_mode<synchronous>, transform_indices = @transform_1, window_bounds = array<i64: 3, 3, 128, 128>}, {pipeline_mode = #tpu.pipeline_mode<synchronous>, transform_indices = @transform_2, window_bounds = array<i64: 3, 3, 128, 128>}, {pipeline_mode = #tpu.pipeline_mode<synchronous>, transform_indices = @transform_3, window_bounds = array<i64: 1, 128>}, {pipeline_mode = #tpu.pipeline_mode<synchronous>, transform_indices = @transform_4, window_bounds = array<i64: 1, 128>}, {pipeline_mode = #tpu.pipeline_mode<synchronous>, transform_indices = @transform_5, window_bounds = array<i64: 1, 128>}, {pipeline_mode = #tpu.pipeline_mode<synchronous>, transform_indices = @transform_6, window_bounds = array<i64: 1, 128>}, {pipeline_mode = #tpu.pipeline_mode<synchronous>, transform_indices = @transform_7, window_bounds = array<i64: 128, 128>}, {pipeline_mode = #tpu.pipeline_mode<synchronous>, transform_indices = @transform_8, window_bounds = array<i64: 1, 128>}, {transform_indices = @transform_9, window_bounds = array<i64: 1, 1, 128>}]} {
    %cst = arith.constant 0.000000e+00 : f32
    %0 = vector.broadcast %cst : f32 to vector<64x128xf32>
    %c0 = arith.constant 0 : index
    %c0_0 = arith.constant 0 : index
    %c0_1 = arith.constant 0 : index
    %c0_2 = arith.constant 0 : index
    %1 = vector.load %arg1[%c0, %c0_0, %c0_1, %c0_2] : memref<1x10x10x128xf32, #tpu.memory_space<vmem>>, vector<1x8x8x128xf32>
    %2 = vector.shape_cast %1 : vector<1x8x8x128xf32> to vector<8x8x128xf32>
    %3 = vector.shape_cast %2 : vector<8x8x128xf32> to vector<64x128xf32>
    %4 = arith.truncf %3 : vector<64x128xf32> to vector<64x128xbf16>
    %c0_3 = arith.constant 0 : index
    %c0_4 = arith.constant 0 : index
    %c0_5 = arith.constant 0 : index
    %c0_6 = arith.constant 0 : index
    %5 = vector.load %arg2[%c0_3, %c0_4, %c0_5, %c0_6] : memref<3x3x128x128xbf16, #tpu.memory_space<vmem>>, vector<1x1x128x128xbf16>
    %6 = vector.shape_cast %5 : vector<1x1x128x128xbf16> to vector<128x128xbf16>
    %cst_7 = arith.constant dense<0.000000e+00> : vector<64x128xf32>
    %7 = tpu.matmul %4, %6, %cst_7 {dimension_numbers = #tpu.dot_dimension_numbers<[1], [0], [0], [1], [0, 0, 1, 1], [], []>} : vector<64x128xbf16>, vector<128x128xbf16>, vector<64x128xf32> -> vector<64x128xf32>
    %8 = arith.addf %0, %7 : vector<64x128xf32>
    %c0_8 = arith.constant 0 : index
    %c0_9 = arith.constant 0 : index
    %c1 = arith.constant 1 : index
    %c0_10 = arith.constant 0 : index
    %9 = vector.load %arg1[%c0_8, %c0_9, %c1, %c0_10] : memref<1x10x10x128xf32, #tpu.memory_space<vmem>>, vector<1x8x8x128xf32>
    %10 = vector.shape_cast %9 : vector<1x8x8x128xf32> to vector<8x8x128xf32>
    %11 = vector.shape_cast %10 : vector<8x8x128xf32> to vector<64x128xf32>
    %12 = arith.truncf %11 : vector<64x128xf32> to vector<64x128xbf16>
    %c0_11 = arith.constant 0 : index
    %c1_12 = arith.constant 1 : index
    %c0_13 = arith.constant 0 : index
    %c0_14 = arith.constant 0 : index
    %13 = vector.load %arg2[%c0_11, %c1_12, %c0_13, %c0_14] : memref<3x3x128x128xbf16, #tpu.memory_space<vmem>>, vector<1x1x128x128xbf16>
    %14 = vector.shape_cast %13 : vector<1x1x128x128xbf16> to vector<128x128xbf16>
    %cst_15 = arith.constant dense<0.000000e+00> : vector<64x128xf32>
    %15 = tpu.matmul %12, %14, %cst_15 {dimension_numbers = #tpu.dot_dimension_numbers<[1], [0], [0], [1], [0, 0, 1, 1], [], []>} : vector<64x128xbf16>, vector<128x128xbf16>, vector<64x128xf32> -> vector<64x128xf32>
    %16 = arith.addf %8, %15 : vector<64x128xf32>
    %c0_16 = arith.constant 0 : index
    %c0_17 = arith.constant 0 : index
    %c2 = arith.constant 2 : index
    %c0_18 = arith.constant 0 : index
    %17 = vector.load %arg1[%c0_16, %c0_17, %c2, %c0_18] : memref<1x10x10x128xf32, #tpu.memory_space<vmem>>, vector<1x8x8x128xf32>
    %18 = vector.shape_cast %17 : vector<1x8x8x128xf32> to vector<8x8x128xf32>
    %19 = vector.shape_cast %18 : vector<8x8x128xf32> to vector<64x128xf32>
    %20 = arith.truncf %19 : vector<64x128xf32> to vector<64x128xbf16>
    %c0_19 = arith.constant 0 : index
    %c2_20 = arith.constant 2 : index
    %c0_21 = arith.constant 0 : index
    %c0_22 = arith.constant 0 : index
    %21 = vector.load %arg2[%c0_19, %c2_20, %c0_21, %c0_22] : memref<3x3x128x128xbf16, #tpu.memory_space<vmem>>, vector<1x1x128x128xbf16>
    %22 = vector.shape_cast %21 : vector<1x1x128x128xbf16> to vector<128x128xbf16>
    %cst_23 = arith.constant dense<0.000000e+00> : vector<64x128xf32>
    %23 = tpu.matmul %20, %22, %cst_23 {dimension_numbers = #tpu.dot_dimension_numbers<[1], [0], [0], [1], [0, 0, 1, 1], [], []>} : vector<64x128xbf16>, vector<128x128xbf16>, vector<64x128xf32> -> vector<64x128xf32>
    %24 = arith.addf %16, %23 : vector<64x128xf32>
    %c0_24 = arith.constant 0 : index
    %c1_25 = arith.constant 1 : index
    %c0_26 = arith.constant 0 : index
    %c0_27 = arith.constant 0 : index
    %25 = vector.load %arg1[%c0_24, %c1_25, %c0_26, %c0_27] : memref<1x10x10x128xf32, #tpu.memory_space<vmem>>, vector<1x8x8x128xf32>
    %26 = vector.shape_cast %25 : vector<1x8x8x128xf32> to vector<8x8x128xf32>
    %27 = vector.shape_cast %26 : vector<8x8x128xf32> to vector<64x128xf32>
    %28 = arith.truncf %27 : vector<64x128xf32> to vector<64x128xbf16>
    %c1_28 = arith.constant 1 : index
    %c0_29 = arith.constant 0 : index
    %c0_30 = arith.constant 0 : index
    %c0_31 = arith.constant 0 : index
    %29 = vector.load %arg2[%c1_28, %c0_29, %c0_30, %c0_31] : memref<3x3x128x128xbf16, #tpu.memory_space<vmem>>, vector<1x1x128x128xbf16>
    %30 = vector.shape_cast %29 : vector<1x1x128x128xbf16> to vector<128x128xbf16>
    %cst_32 = arith.constant dense<0.000000e+00> : vector<64x128xf32>
    %31 = tpu.matmul %28, %30, %cst_32 {dimension_numbers = #tpu.dot_dimension_numbers<[1], [0], [0], [1], [0, 0, 1, 1], [], []>} : vector<64x128xbf16>, vector<128x128xbf16>, vector<64x128xf32> -> vector<64x128xf32>
    %32 = arith.addf %24, %31 : vector<64x128xf32>
    %c0_33 = arith.constant 0 : index
    %c1_34 = arith.constant 1 : index
    %c1_35 = arith.constant 1 : index
    %c0_36 = arith.constant 0 : index
    %33 = vector.load %arg1[%c0_33, %c1_34, %c1_35, %c0_36] : memref<1x10x10x128xf32, #tpu.memory_space<vmem>>, vector<1x8x8x128xf32>
    %34 = vector.shape_cast %33 : vector<1x8x8x128xf32> to vector<8x8x128xf32>
    %35 = vector.shape_cast %34 : vector<8x8x128xf32> to vector<64x128xf32>
    %36 = arith.truncf %35 : vector<64x128xf32> to vector<64x128xbf16>
    %c1_37 = arith.constant 1 : index
    %c1_38 = arith.constant 1 : index
    %c0_39 = arith.constant 0 : index
    %c0_40 = arith.constant 0 : index
    %37 = vector.load %arg2[%c1_37, %c1_38, %c0_39, %c0_40] : memref<3x3x128x128xbf16, #tpu.memory_space<vmem>>, vector<1x1x128x128xbf16>
    %38 = vector.shape_cast %37 : vector<1x1x128x128xbf16> to vector<128x128xbf16>
    %cst_41 = arith.constant dense<0.000000e+00> : vector<64x128xf32>
    %39 = tpu.matmul %36, %38, %cst_41 {dimension_numbers = #tpu.dot_dimension_numbers<[1], [0], [0], [1], [0, 0, 1, 1], [], []>} : vector<64x128xbf16>, vector<128x128xbf16>, vector<64x128xf32> -> vector<64x128xf32>
    %40 = arith.addf %32, %39 : vector<64x128xf32>
    %c0_42 = arith.constant 0 : index
    %c1_43 = arith.constant 1 : index
    %c2_44 = arith.constant 2 : index
    %c0_45 = arith.constant 0 : index
    %41 = vector.load %arg1[%c0_42, %c1_43, %c2_44, %c0_45] : memref<1x10x10x128xf32, #tpu.memory_space<vmem>>, vector<1x8x8x128xf32>
    %42 = vector.shape_cast %41 : vector<1x8x8x128xf32> to vector<8x8x128xf32>
    %43 = vector.shape_cast %42 : vector<8x8x128xf32> to vector<64x128xf32>
    %44 = arith.truncf %43 : vector<64x128xf32> to vector<64x128xbf16>
    %c1_46 = arith.constant 1 : index
    %c2_47 = arith.constant 2 : index
    %c0_48 = arith.constant 0 : index
    %c0_49 = arith.constant 0 : index
    %45 = vector.load %arg2[%c1_46, %c2_47, %c0_48, %c0_49] : memref<3x3x128x128xbf16, #tpu.memory_space<vmem>>, vector<1x1x128x128xbf16>
    %46 = vector.shape_cast %45 : vector<1x1x128x128xbf16> to vector<128x128xbf16>
    %cst_50 = arith.constant dense<0.000000e+00> : vector<64x128xf32>
    %47 = tpu.matmul %44, %46, %cst_50 {dimension_numbers = #tpu.dot_dimension_numbers<[1], [0], [0], [1], [0, 0, 1, 1], [], []>} : vector<64x128xbf16>, vector<128x128xbf16>, vector<64x128xf32> -> vector<64x128xf32>
    %48 = arith.addf %40, %47 : vector<64x128xf32>
    %c0_51 = arith.constant 0 : index
    %c2_52 = arith.constant 2 : index
    %c0_53 = arith.constant 0 : index
    %c0_54 = arith.constant 0 : index
    %49 = vector.load %arg1[%c0_51, %c2_52, %c0_53, %c0_54] : memref<1x10x10x128xf32, #tpu.memory_space<vmem>>, vector<1x8x8x128xf32>
    %50 = vector.shape_cast %49 : vector<1x8x8x128xf32> to vector<8x8x128xf32>
    %51 = vector.shape_cast %50 : vector<8x8x128xf32> to vector<64x128xf32>
    %52 = arith.truncf %51 : vector<64x128xf32> to vector<64x128xbf16>
    %c2_55 = arith.constant 2 : index
    %c0_56 = arith.constant 0 : index
    %c0_57 = arith.constant 0 : index
    %c0_58 = arith.constant 0 : index
    %53 = vector.load %arg2[%c2_55, %c0_56, %c0_57, %c0_58] : memref<3x3x128x128xbf16, #tpu.memory_space<vmem>>, vector<1x1x128x128xbf16>
    %54 = vector.shape_cast %53 : vector<1x1x128x128xbf16> to vector<128x128xbf16>
    %cst_59 = arith.constant dense<0.000000e+00> : vector<64x128xf32>
    %55 = tpu.matmul %52, %54, %cst_59 {dimension_numbers = #tpu.dot_dimension_numbers<[1], [0], [0], [1], [0, 0, 1, 1], [], []>} : vector<64x128xbf16>, vector<128x128xbf16>, vector<64x128xf32> -> vector<64x128xf32>
    %56 = arith.addf %48, %55 : vector<64x128xf32>
    %c0_60 = arith.constant 0 : index
    %c2_61 = arith.constant 2 : index
    %c1_62 = arith.constant 1 : index
    %c0_63 = arith.constant 0 : index
    %57 = vector.load %arg1[%c0_60, %c2_61, %c1_62, %c0_63] : memref<1x10x10x128xf32, #tpu.memory_space<vmem>>, vector<1x8x8x128xf32>
    %58 = vector.shape_cast %57 : vector<1x8x8x128xf32> to vector<8x8x128xf32>
    %59 = vector.shape_cast %58 : vector<8x8x128xf32> to vector<64x128xf32>
    %60 = arith.truncf %59 : vector<64x128xf32> to vector<64x128xbf16>
    %c2_64 = arith.constant 2 : index
    %c1_65 = arith.constant 1 : index
    %c0_66 = arith.constant 0 : index
    %c0_67 = arith.constant 0 : index
    %61 = vector.load %arg2[%c2_64, %c1_65, %c0_66, %c0_67] : memref<3x3x128x128xbf16, #tpu.memory_space<vmem>>, vector<1x1x128x128xbf16>
    %62 = vector.shape_cast %61 : vector<1x1x128x128xbf16> to vector<128x128xbf16>
    %cst_68 = arith.constant dense<0.000000e+00> : vector<64x128xf32>
    %63 = tpu.matmul %60, %62, %cst_68 {dimension_numbers = #tpu.dot_dimension_numbers<[1], [0], [0], [1], [0, 0, 1, 1], [], []>} : vector<64x128xbf16>, vector<128x128xbf16>, vector<64x128xf32> -> vector<64x128xf32>
    %64 = arith.addf %56, %63 : vector<64x128xf32>
    %c0_69 = arith.constant 0 : index
    %c2_70 = arith.constant 2 : index
    %c2_71 = arith.constant 2 : index
    %c0_72 = arith.constant 0 : index
    %65 = vector.load %arg1[%c0_69, %c2_70, %c2_71, %c0_72] : memref<1x10x10x128xf32, #tpu.memory_space<vmem>>, vector<1x8x8x128xf32>
    %66 = vector.shape_cast %65 : vector<1x8x8x128xf32> to vector<8x8x128xf32>
    %67 = vector.shape_cast %66 : vector<8x8x128xf32> to vector<64x128xf32>
    %68 = arith.truncf %67 : vector<64x128xf32> to vector<64x128xbf16>
    %c2_73 = arith.constant 2 : index
    %c2_74 = arith.constant 2 : index
    %c0_75 = arith.constant 0 : index
    %c0_76 = arith.constant 0 : index
    %69 = vector.load %arg2[%c2_73, %c2_74, %c0_75, %c0_76] : memref<3x3x128x128xbf16, #tpu.memory_space<vmem>>, vector<1x1x128x128xbf16>
    %70 = vector.shape_cast %69 : vector<1x1x128x128xbf16> to vector<128x128xbf16>
    %cst_77 = arith.constant dense<0.000000e+00> : vector<64x128xf32>
    %71 = tpu.matmul %68, %70, %cst_77 {dimension_numbers = #tpu.dot_dimension_numbers<[1], [0], [0], [1], [0, 0, 1, 1], [], []>} : vector<64x128xbf16>, vector<128x128xbf16>, vector<64x128xf32> -> vector<64x128xf32>
    %72 = arith.addf %64, %71 : vector<64x128xf32>
    %c0_78 = arith.constant 0 : index
    %c0_79 = arith.constant 0 : index
    %73 = vector.load %arg4[%c0_78, %c0_79] : memref<1x128xf32, #tpu.memory_space<vmem>>, vector<1x128xf32>
    %74 = vector.broadcast %73 : vector<1x128xf32> to vector<64x128xf32>
    %75 = arith.mulf %72, %74 : vector<64x128xf32>
    %c0_80 = arith.constant 0 : index
    %c0_81 = arith.constant 0 : index
    %76 = vector.load %arg5[%c0_80, %c0_81] : memref<1x128xf32, #tpu.memory_space<vmem>>, vector<1x128xf32>
    %77 = vector.broadcast %76 : vector<1x128xf32> to vector<64x128xf32>
    %78 = arith.addf %75, %77 : vector<64x128xf32>
    %cst_82 = arith.constant 0.000000e+00 : f32
    %79 = vector.broadcast %cst_82 : f32 to vector<64x128xf32>
    %80 = arith.maximumf %78, %79 : vector<64x128xf32>
    %cst_83 = arith.constant 0.000000e+00 : f32
    %81 = vector.broadcast %cst_83 : f32 to vector<10x10x128xf32>
    %c0_84 = arith.constant 0 : index
    %c0_85 = arith.constant 0 : index
    %c0_86 = arith.constant 0 : index
    %82 = vector.load %arg11[%c0_84, %c0_85, %c0_86] : memref<10x10x128xf32, #tpu.memory_space<vmem>>, vector<10x10x128xf32>
    tpu.vector_store %arg11[%c0_84, %c0_85, %c0_86], %81 {strides = array<i32>} : memref<10x10x128xf32, #tpu.memory_space<vmem>>, vector<10x10x128xf32>,
    %83 = vector.shape_cast %80 : vector<64x128xf32> to vector<8x8x128xf32>
    %c1_87 = arith.constant 1 : index
    %c1_88 = arith.constant 1 : index
    %c0_89 = arith.constant 0 : index
    %84 = vector.load %arg11[%c1_87, %c1_88, %c0_89] : memref<10x10x128xf32, #tpu.memory_space<vmem>>, vector<8x8x128xf32>
    tpu.vector_store %arg11[%c1_87, %c1_88, %c0_89], %83 {strides = array<i32>} : memref<10x10x128xf32, #tpu.memory_space<vmem>>, vector<8x8x128xf32>,
    %cst_90 = arith.constant 0.000000e+00 : f32
    %85 = vector.broadcast %cst_90 : f32 to vector<64x128xf32>
    %c0_91 = arith.constant 0 : index
    %c0_92 = arith.constant 0 : index
    %c0_93 = arith.constant 0 : index
    %86 = vector.load %arg11[%c0_91, %c0_92, %c0_93] : memref<10x10x128xf32, #tpu.memory_space<vmem>>, vector<8x8x128xf32>
    %87 = vector.shape_cast %86 : vector<8x8x128xf32> to vector<64x128xf32>
    %88 = arith.truncf %87 : vector<64x128xf32> to vector<64x128xbf16>
    %c0_94 = arith.constant 0 : index
    %c0_95 = arith.constant 0 : index
    %c0_96 = arith.constant 0 : index
    %c0_97 = arith.constant 0 : index
    %89 = vector.load %arg3[%c0_94, %c0_95, %c0_96, %c0_97] : memref<3x3x128x128xbf16, #tpu.memory_space<vmem>>, vector<1x1x128x128xbf16>
    %90 = vector.shape_cast %89 : vector<1x1x128x128xbf16> to vector<128x128xbf16>
    %cst_98 = arith.constant dense<0.000000e+00> : vector<64x128xf32>
    %91 = tpu.matmul %88, %90, %cst_98 {dimension_numbers = #tpu.dot_dimension_numbers<[1], [0], [0], [1], [0, 0, 1, 1], [], []>} : vector<64x128xbf16>, vector<128x128xbf16>, vector<64x128xf32> -> vector<64x128xf32>
    %92 = arith.addf %85, %91 : vector<64x128xf32>
    %c0_99 = arith.constant 0 : index
    %c1_100 = arith.constant 1 : index
    %c0_101 = arith.constant 0 : index
    %93 = vector.load %arg11[%c0_99, %c1_100, %c0_101] : memref<10x10x128xf32, #tpu.memory_space<vmem>>, vector<8x8x128xf32>
    %94 = vector.shape_cast %93 : vector<8x8x128xf32> to vector<64x128xf32>
    %95 = arith.truncf %94 : vector<64x128xf32> to vector<64x128xbf16>
    %c0_102 = arith.constant 0 : index
    %c1_103 = arith.constant 1 : index
    %c0_104 = arith.constant 0 : index
    %c0_105 = arith.constant 0 : index
    %96 = vector.load %arg3[%c0_102, %c1_103, %c0_104, %c0_105] : memref<3x3x128x128xbf16, #tpu.memory_space<vmem>>, vector<1x1x128x128xbf16>
    %97 = vector.shape_cast %96 : vector<1x1x128x128xbf16> to vector<128x128xbf16>
    %cst_106 = arith.constant dense<0.000000e+00> : vector<64x128xf32>
    %98 = tpu.matmul %95, %97, %cst_106 {dimension_numbers = #tpu.dot_dimension_numbers<[1], [0], [0], [1], [0, 0, 1, 1], [], []>} : vector<64x128xbf16>, vector<128x128xbf16>, vector<64x128xf32> -> vector<64x128xf32>
    %99 = arith.addf %92, %98 : vector<64x128xf32>
    %c0_107 = arith.constant 0 : index
    %c2_108 = arith.constant 2 : index
    %c0_109 = arith.constant 0 : index
    %100 = vector.load %arg11[%c0_107, %c2_108, %c0_109] : memref<10x10x128xf32, #tpu.memory_space<vmem>>, vector<8x8x128xf32>
    %101 = vector.shape_cast %100 : vector<8x8x128xf32> to vector<64x128xf32>
    %102 = arith.truncf %101 : vector<64x128xf32> to vector<64x128xbf16>
    %c0_110 = arith.constant 0 : index
    %c2_111 = arith.constant 2 : index
    %c0_112 = arith.constant 0 : index
    %c0_113 = arith.constant 0 : index
    %103 = vector.load %arg3[%c0_110, %c2_111, %c0_112, %c0_113] : memref<3x3x128x128xbf16, #tpu.memory_space<vmem>>, vector<1x1x128x128xbf16>
    %104 = vector.shape_cast %103 : vector<1x1x128x128xbf16> to vector<128x128xbf16>
    %cst_114 = arith.constant dense<0.000000e+00> : vector<64x128xf32>
    %105 = tpu.matmul %102, %104, %cst_114 {dimension_numbers = #tpu.dot_dimension_numbers<[1], [0], [0], [1], [0, 0, 1, 1], [], []>} : vector<64x128xbf16>, vector<128x128xbf16>, vector<64x128xf32> -> vector<64x128xf32>
    %106 = arith.addf %99, %105 : vector<64x128xf32>
    %c1_115 = arith.constant 1 : index
    %c0_116 = arith.constant 0 : index
    %c0_117 = arith.constant 0 : index
    %107 = vector.load %arg11[%c1_115, %c0_116, %c0_117] : memref<10x10x128xf32, #tpu.memory_space<vmem>>, vector<8x8x128xf32>
    %108 = vector.shape_cast %107 : vector<8x8x128xf32> to vector<64x128xf32>
    %109 = arith.truncf %108 : vector<64x128xf32> to vector<64x128xbf16>
    %c1_118 = arith.constant 1 : index
    %c0_119 = arith.constant 0 : index
    %c0_120 = arith.constant 0 : index
    %c0_121 = arith.constant 0 : index
    %110 = vector.load %arg3[%c1_118, %c0_119, %c0_120, %c0_121] : memref<3x3x128x128xbf16, #tpu.memory_space<vmem>>, vector<1x1x128x128xbf16>
    %111 = vector.shape_cast %110 : vector<1x1x128x128xbf16> to vector<128x128xbf16>
    %cst_122 = arith.constant dense<0.000000e+00> : vector<64x128xf32>
    %112 = tpu.matmul %109, %111, %cst_122 {dimension_numbers = #tpu.dot_dimension_numbers<[1], [0], [0], [1], [0, 0, 1, 1], [], []>} : vector<64x128xbf16>, vector<128x128xbf16>, vector<64x128xf32> -> vector<64x128xf32>
    %113 = arith.addf %106, %112 : vector<64x128xf32>
    %c1_123 = arith.constant 1 : index
    %c1_124 = arith.constant 1 : index
    %c0_125 = arith.constant 0 : index
    %114 = vector.load %arg11[%c1_123, %c1_124, %c0_125] : memref<10x10x128xf32, #tpu.memory_space<vmem>>, vector<8x8x128xf32>
    %115 = vector.shape_cast %114 : vector<8x8x128xf32> to vector<64x128xf32>
    %116 = arith.truncf %115 : vector<64x128xf32> to vector<64x128xbf16>
    %c1_126 = arith.constant 1 : index
    %c1_127 = arith.constant 1 : index
    %c0_128 = arith.constant 0 : index
    %c0_129 = arith.constant 0 : index
    %117 = vector.load %arg3[%c1_126, %c1_127, %c0_128, %c0_129] : memref<3x3x128x128xbf16, #tpu.memory_space<vmem>>, vector<1x1x128x128xbf16>
    %118 = vector.shape_cast %117 : vector<1x1x128x128xbf16> to vector<128x128xbf16>
    %cst_130 = arith.constant dense<0.000000e+00> : vector<64x128xf32>
    %119 = tpu.matmul %116, %118, %cst_130 {dimension_numbers = #tpu.dot_dimension_numbers<[1], [0], [0], [1], [0, 0, 1, 1], [], []>} : vector<64x128xbf16>, vector<128x128xbf16>, vector<64x128xf32> -> vector<64x128xf32>
    %120 = arith.addf %113, %119 : vector<64x128xf32>
    %c1_131 = arith.constant 1 : index
    %c2_132 = arith.constant 2 : index
    %c0_133 = arith.constant 0 : index
    %121 = vector.load %arg11[%c1_131, %c2_132, %c0_133] : memref<10x10x128xf32, #tpu.memory_space<vmem>>, vector<8x8x128xf32>
    %122 = vector.shape_cast %121 : vector<8x8x128xf32> to vector<64x128xf32>
    %123 = arith.truncf %122 : vector<64x128xf32> to vector<64x128xbf16>
    %c1_134 = arith.constant 1 : index
    %c2_135 = arith.constant 2 : index
    %c0_136 = arith.constant 0 : index
    %c0_137 = arith.constant 0 : index
    %124 = vector.load %arg3[%c1_134, %c2_135, %c0_136, %c0_137] : memref<3x3x128x128xbf16, #tpu.memory_space<vmem>>, vector<1x1x128x128xbf16>
    %125 = vector.shape_cast %124 : vector<1x1x128x128xbf16> to vector<128x128xbf16>
    %cst_138 = arith.constant dense<0.000000e+00> : vector<64x128xf32>
    %126 = tpu.matmul %123, %125, %cst_138 {dimension_numbers = #tpu.dot_dimension_numbers<[1], [0], [0], [1], [0, 0, 1, 1], [], []>} : vector<64x128xbf16>, vector<128x128xbf16>, vector<64x128xf32> -> vector<64x128xf32>
    %127 = arith.addf %120, %126 : vector<64x128xf32>
    %c2_139 = arith.constant 2 : index
    %c0_140 = arith.constant 0 : index
    %c0_141 = arith.constant 0 : index
    %128 = vector.load %arg11[%c2_139, %c0_140, %c0_141] : memref<10x10x128xf32, #tpu.memory_space<vmem>>, vector<8x8x128xf32>
    %129 = vector.shape_cast %128 : vector<8x8x128xf32> to vector<64x128xf32>
    %130 = arith.truncf %129 : vector<64x128xf32> to vector<64x128xbf16>
    %c2_142 = arith.constant 2 : index
    %c0_143 = arith.constant 0 : index
    %c0_144 = arith.constant 0 : index
    %c0_145 = arith.constant 0 : index
    %131 = vector.load %arg3[%c2_142, %c0_143, %c0_144, %c0_145] : memref<3x3x128x128xbf16, #tpu.memory_space<vmem>>, vector<1x1x128x128xbf16>
    %132 = vector.shape_cast %131 : vector<1x1x128x128xbf16> to vector<128x128xbf16>
    %cst_146 = arith.constant dense<0.000000e+00> : vector<64x128xf32>
    %133 = tpu.matmul %130, %132, %cst_146 {dimension_numbers = #tpu.dot_dimension_numbers<[1], [0], [0], [1], [0, 0, 1, 1], [], []>} : vector<64x128xbf16>, vector<128x128xbf16>, vector<64x128xf32> -> vector<64x128xf32>
    %134 = arith.addf %127, %133 : vector<64x128xf32>
    %c2_147 = arith.constant 2 : index
    %c1_148 = arith.constant 1 : index
    %c0_149 = arith.constant 0 : index
    %135 = vector.load %arg11[%c2_147, %c1_148, %c0_149] : memref<10x10x128xf32, #tpu.memory_space<vmem>>, vector<8x8x128xf32>
    %136 = vector.shape_cast %135 : vector<8x8x128xf32> to vector<64x128xf32>
    %137 = arith.truncf %136 : vector<64x128xf32> to vector<64x128xbf16>
    %c2_150 = arith.constant 2 : index
    %c1_151 = arith.constant 1 : index
    %c0_152 = arith.constant 0 : index
    %c0_153 = arith.constant 0 : index
    %138 = vector.load %arg3[%c2_150, %c1_151, %c0_152, %c0_153] : memref<3x3x128x128xbf16, #tpu.memory_space<vmem>>, vector<1x1x128x128xbf16>
    %139 = vector.shape_cast %138 : vector<1x1x128x128xbf16> to vector<128x128xbf16>
    %cst_154 = arith.constant dense<0.000000e+00> : vector<64x128xf32>
    %140 = tpu.matmul %137, %139, %cst_154 {dimension_numbers = #tpu.dot_dimension_numbers<[1], [0], [0], [1], [0, 0, 1, 1], [], []>} : vector<64x128xbf16>, vector<128x128xbf16>, vector<64x128xf32> -> vector<64x128xf32>
    %141 = arith.addf %134, %140 : vector<64x128xf32>
    %c2_155 = arith.constant 2 : index
    %c2_156 = arith.constant 2 : index
    %c0_157 = arith.constant 0 : index
    %142 = vector.load %arg11[%c2_155, %c2_156, %c0_157] : memref<10x10x128xf32, #tpu.memory_space<vmem>>, vector<8x8x128xf32>
    %143 = vector.shape_cast %142 : vector<8x8x128xf32> to vector<64x128xf32>
    %144 = arith.truncf %143 : vector<64x128xf32> to vector<64x128xbf16>
    %c2_158 = arith.constant 2 : index
    %c2_159 = arith.constant 2 : index
    %c0_160 = arith.constant 0 : index
    %c0_161 = arith.constant 0 : index
    %145 = vector.load %arg3[%c2_158, %c2_159, %c0_160, %c0_161] : memref<3x3x128x128xbf16, #tpu.memory_space<vmem>>, vector<1x1x128x128xbf16>
    %146 = vector.shape_cast %145 : vector<1x1x128x128xbf16> to vector<128x128xbf16>
    %cst_162 = arith.constant dense<0.000000e+00> : vector<64x128xf32>
    %147 = tpu.matmul %144, %146, %cst_162 {dimension_numbers = #tpu.dot_dimension_numbers<[1], [0], [0], [1], [0, 0, 1, 1], [], []>} : vector<64x128xbf16>, vector<128x128xbf16>, vector<64x128xf32> -> vector<64x128xf32>
    %148 = arith.addf %141, %147 : vector<64x128xf32>
    %c0_163 = arith.constant 0 : index
    %c1_164 = arith.constant 1 : index
    %c1_165 = arith.constant 1 : index
    %c0_166 = arith.constant 0 : index
    %149 = vector.load %arg1[%c0_163, %c1_164, %c1_165, %c0_166] : memref<1x10x10x128xf32, #tpu.memory_space<vmem>>, vector<1x8x8x128xf32>
    %150 = vector.shape_cast %149 : vector<1x8x8x128xf32> to vector<8x8x128xf32>
    %151 = vector.shape_cast %150 : vector<8x8x128xf32> to vector<64x128xf32>
    %c0_167 = arith.constant 0 : index
    %c0_168 = arith.constant 0 : index
    %152 = vector.load %arg6[%c0_167, %c0_168] : memref<1x128xf32, #tpu.memory_space<vmem>>, vector<1x128xf32>
    %153 = vector.broadcast %152 : vector<1x128xf32> to vector<64x128xf32>
    %154 = arith.mulf %148, %153 : vector<64x128xf32>
    %c0_169 = arith.constant 0 : index
    %c0_170 = arith.constant 0 : index
    %155 = vector.load %arg7[%c0_169, %c0_170] : memref<1x128xf32, #tpu.memory_space<vmem>>, vector<1x128xf32>
    %156 = vector.broadcast %155 : vector<1x128xf32> to vector<64x128xf32>
    %157 = arith.addf %154, %156 : vector<64x128xf32>
    %158 = arith.addf %157, %151 : vector<64x128xf32>
    %cst_171 = arith.constant 0.000000e+00 : f32
    %159 = vector.broadcast %cst_171 : f32 to vector<64x128xf32>
    %160 = arith.maximumf %158, %159 : vector<64x128xf32>
    %cst_172 = arith.constant dense<0.000000e+00> : vector<128xf32>
    %161 = vector.multi_reduction <add>, %160, %cst_172 [0] : vector<64x128xf32> to vector<128xf32>
    %162 = vector.shape_cast %161 : vector<128xf32> to vector<1x128xf32>
    %cst_173 = arith.constant 6.400000e+01 : f32
    %163 = vector.broadcast %cst_173 : f32 to vector<1x128xf32>
    %164 = arith.divf %162, %163 : vector<1x128xf32>
    %165 = arith.truncf %164 : vector<1x128xf32> to vector<1x128xbf16>
    %c0_174 = arith.constant 0 : index
    %c0_175 = arith.constant 0 : index
    %166 = vector.load %arg8[%c0_174, %c0_175] : memref<128x128xbf16, #tpu.memory_space<vmem>>, vector<128x128xbf16>
    %cst_176 = arith.constant dense<0.000000e+00> : vector<1x128xf32>
    %167 = tpu.matmul %165, %166, %cst_176 {dimension_numbers = #tpu.dot_dimension_numbers<[1], [0], [0], [1], [0, 0, 1, 1], [], []>} : vector<1x128xbf16>, vector<128x128xbf16>, vector<1x128xf32> -> vector<1x128xf32>
    %c0_177 = arith.constant 0 : index
    %c0_178 = arith.constant 0 : index
    %168 = vector.load %arg9[%c0_177, %c0_178] : memref<1x128xf32, #tpu.memory_space<vmem>>, vector<1x128xf32>
    %169 = arith.addf %167, %168 : vector<1x128xf32>
    %170 = vector.shape_cast %169 : vector<1x128xf32> to vector<1x1x128xf32>
    %c0_179 = arith.constant 0 : index
    %c0_180 = arith.constant 0 : index
    %c0_181 = arith.constant 0 : index
    %171 = vector.load %arg10[%c0_179, %c0_180, %c0_181] : memref<1x1x128xf32, #tpu.memory_space<vmem>>, vector<1x1x128xf32>
    tpu.vector_store %arg10[%c0_179, %c0_180, %c0_181], %170 {strides = array<i32>} : memref<1x1x128xf32, #tpu.memory_space<vmem>>, vector<1x1x128xf32>,
    return
  }
  func.func @transform_0(%arg0: i32) -> (i32, i32, i32, i32) {
    %c0_i32 = arith.constant 0 : i32
    %c0_i32_0 = arith.constant 0 : i32
    %c0_i32_1 = arith.constant 0 : i32
    %c0_i32_2 = arith.constant 0 : i32
    return %arg0, %c0_i32, %c0_i32_0, %c0_i32_1 : i32, i32, i32, i32
  }
  func.func @transform_1(%arg0: i32) -> (i32, i32, i32, i32) {
    %c0_i32 = arith.constant 0 : i32
    %c0_i32_0 = arith.constant 0 : i32
    %c0_i32_1 = arith.constant 0 : i32
    %c0_i32_2 = arith.constant 0 : i32
    %c0_i32_3 = arith.constant 0 : i32
    return %c0_i32, %c0_i32_0, %c0_i32_1, %c0_i32_2 : i32, i32, i32, i32
  }
  func.func @transform_2(%arg0: i32) -> (i32, i32, i32, i32) {
    %c0_i32 = arith.constant 0 : i32
    %c0_i32_0 = arith.constant 0 : i32
    %c0_i32_1 = arith.constant 0 : i32
    %c0_i32_2 = arith.constant 0 : i32
    %c0_i32_3 = arith.constant 0 : i32
    return %c0_i32, %c0_i32_0, %c0_i32_1, %c0_i32_2 : i32, i32, i32, i32
  }
  func.func @transform_3(%arg0: i32) -> (i32, i32) {
    %c0_i32 = arith.constant 0 : i32
    %c0_i32_0 = arith.constant 0 : i32
    %c0_i32_1 = arith.constant 0 : i32
    return %c0_i32, %c0_i32_0 : i32, i32
  }
  func.func @transform_4(%arg0: i32) -> (i32, i32) {
    %c0_i32 = arith.constant 0 : i32
    %c0_i32_0 = arith.constant 0 : i32
    %c0_i32_1 = arith.constant 0 : i32
    return %c0_i32, %c0_i32_0 : i32, i32
  }
  func.func @transform_5(%arg0: i32) -> (i32, i32) {
    %c0_i32 = arith.constant 0 : i32
    %c0_i32_0 = arith.constant 0 : i32
    %c0_i32_1 = arith.constant 0 : i32
    return %c0_i32, %c0_i32_0 : i32, i32
  }
  func.func @transform_6(%arg0: i32) -> (i32, i32) {
    %c0_i32 = arith.constant 0 : i32
    %c0_i32_0 = arith.constant 0 : i32
    %c0_i32_1 = arith.constant 0 : i32
    return %c0_i32, %c0_i32_0 : i32, i32
  }
  func.func @transform_7(%arg0: i32) -> (i32, i32) {
    %c0_i32 = arith.constant 0 : i32
    %c0_i32_0 = arith.constant 0 : i32
    %c0_i32_1 = arith.constant 0 : i32
    return %c0_i32, %c0_i32_0 : i32, i32
  }
  func.func @transform_8(%arg0: i32) -> (i32, i32) {
    %c0_i32 = arith.constant 0 : i32
    %c0_i32_0 = arith.constant 0 : i32
    %c0_i32_1 = arith.constant 0 : i32
    return %c0_i32, %c0_i32_0 : i32, i32
  }
  func.func @transform_9(%arg0: i32) -> (i32, i32, i32) {
    %c0_i32 = arith.constant 0 : i32
    %c0_i32_0 = arith.constant 0 : i32
    %c0_i32_1 = arith.constant 0 : i32
    return %arg0, %c0_i32, %c0_i32_0 : i32, i32, i32
  }
}

</mosaic_0001>

<bundles_post_ra>
// kernel: tpu_custom_call.1
= control target key start
LH: loop header
LB: loop body
LE: loop exit
PB: predicated region body
PF: predicated region fallthrough
CT: control target
= control target key end

     0   :  { %14 = vsyncpa [#allocation4], 0  ;;  %s5319_s0 = inlined_call_operand.vmem [shape: f32[2,10,10,128], index: 0, kind: input, shape index: {}]   ;;  %s5320_s1 = inlined_call_operand.hbm [shape: bf16[3,3,128,128], index: 1, kind: input, shape index: {}]   ;;  %s5321_s2 = inlined_call_operand.hbm [shape: bf16[3,3,128,128], index: 2, kind: input, shape index: {}]   ;;  %s5322_s3 = inlined_call_operand.vmem [shape: f32[1,128], index: 3, kind: input, shape index: {}]   ;;  %s5323_s4 = inlined_call_operand.vmem [shape: f32[1,128], index: 4, kind: input, shape index: {}]   ;;  %s5324_s5 = inlined_call_operand.vmem [shape: f32[1,128], index: 5, kind: input, shape index: {}]   ;;  %s5325_s6 = inlined_call_operand.vmem [shape: f32[1,128], index: 6, kind: input, shape index: {}]   ;;  %s5326_s7 = inlined_call_operand.vmem [shape: bf16[128,128], index: 7, kind: input, shape index: {}]   ;;  %s5327_s8 = inlined_call_operand.vmem [shape: f32[1,128], index: 8, kind: input, shape index: {}]   ;;  %s5328_s9 = inlined_call_operand.hbm [shape: f32[2,1,128], index: 9, kind: output, shape index: {}]  }
   0x1   :  { %15 = vsyncpa [#allocation7], 0 }
   0x2   :  { %16 = vsyncpa [#allocation5], 0 }
   0x3   :  { %18 = vsyncpa [#allocation5 + $0x1], 0  ;;  %s4660_s30 = smov 0   ;;  %s4662_s10 = smov 0  }
   0x4   :  { %s4664_s11 = smov 0   ;;  %s4666_s12 = smov 0  }
   0x5 LB: > { %s4681_s13 = sadd.s32 4294967295, %s4601_s12   ;;  %s3363_s14 = sadd.s32 4294967294, %s4601_s12   ;;  %s4601_s12 = sphi %s4666_s12, %s5371_s12   ;;  %s4597_s11 = sphi %s4664_s11, %s5370_s11   ;;  %s4593_s10 = sphi %s4662_s10, %s5369_s10   ;;  %s4589_s30 = sphi %s4660_s30, %s5368_s30  }
   0x6   : > { %s4685_s15 = sadd.s32 1, %s4601_s12   ;;  %s225_s16 = sadd.s32 1, %s4597_s11 }
   0x7   : > { %s222_s17 = ssub.s32 %s4601_s12, %s4685_s15  ;;  %p235_p0 = scmp.ne.s32.totalorder %s4597_s11, %s4593_s10 }
   0x8   : > { %p223_p1 = scmp.eq.s32.totalorder %s222_s17, 0  ;;  %p236_p2 = scmp.eq.s32.totalorder %s4681_s13, 1 }
   0x9   : > { %p241_p3 = scmp.ne.s32.totalorder %s4593_s10, %s4589_s30  ;;  %p242_p4 = scmp.eq.s32.totalorder %s3363_s14, 1 }
   0xa   : > { %s4696_s18 = scalar_select %p223_p1, %s4597_s11, %s225_s16  }
   0xb   : > { %p4698_p5 = por %p236_p2, %p235_p0  ;;  %p4702_p6 = por %p242_p4, %p241_p3 }
   0xc   : > { %p3364_p7 = scmp.ge.s32.totalorder %s4601_s12, 1  ;;  %p249_p8 = scmp.lt.s32.totalorder %s4601_s12, 3 }
   0xd   : > { %s5335_s20 = scalar_select %p4702_p6, 1, 0 }
   0xe   : > { %p5329_p9 = scmp.eq.s32.totalorder %s4681_s13, 0  ;;  %p4709_p10 = pnand %p3364_p7, %p249_p8 }
   0xf   : > { %s4603_s22 = smov [#allocation3]   ;;  %s4604_s25 = smov [#allocation6]  }
  0x10   : > { %s261_s23 = sshll.u32 %s4603_s22, 4  ;;  %p4275_p11 = pneg %p4709_p10  ;;  %s262_s23 = int_to_ptr.vmem [resolvable:$true] %s261_s23 }
  0x11   : > { %s274_s26 = sshll.u32 %s4604_s25, 4  ;;  %s4492_s27 = scalar_lea.vmem %s262_s23, 9216  ;;  %s275_s26 = int_to_ptr.vmem [resolvable:$true] %s274_s26 }
  0x12   : > { %p4717_p12 = pnand %p5329_p9, %p4275_p11  ;;  %p4493_p0 = scmp.ne.s32.totalorder %s262_s23, %s4492_s27 }
  0x13   : > { %p4500_p3 = scmp.lt.s32.totalorder %s262_s23, %s262_s23  ;;  %p4501_p4 = scmp.lt.s32.totalorder %s4492_s27, %s4492_s27 }
  0x14   : > { %p4483_p13 = pneg %p4717_p12 }
  0x15   : > { %p4502_p7 = por %p4501_p4, %p4500_p3 }
  0x16   : > { %p4495_p1 = pnand %p4493_p0, %p4483_p13 }
  0x18   : > { %p4496_p2 = pneg %p4495_p1 }
  0x1a   : > { %p4503_p8 = pnand %p4502_p7, %p4496_p2 }
  0x1c   : > { %4506 = shalt.err (!%p4503_p8)
}
  0x1d   : > { %s4605_s28 = smov 64   ;;  %s4606_s29 = smov 4  }
  0x1e   : > { %4278 = dma.hbm_to_vmem [thread:$0]  (!%p4717_p12), %s5320_s1, 9216, %s262_s23, [#allocation4], %s4605_s28, %s4605_s28, %s4606_s29  }
  0x1f   : > { %s4518_s17 = scalar_lea.vmem %s275_s26, 9216  ;;  %p4526_p9 = scmp.lt.s32.totalorder %s275_s26, %s275_s26 }
  0x20   : > { %p4519_p11 = scmp.ne.s32.totalorder %s275_s26, %s4518_s17  ;;  %p4527_p6 = scmp.lt.s32.totalorder %s4518_s17, %s4518_s17 }
  0x22   : > { %p4521_p0 = pnand %p4519_p11, %p4483_p13  ;;  %p4528_p3 = por %p4527_p6, %p4526_p9 }
  0x24   : > { %p4522_p1 = pneg %p4521_p0 }
  0x26   : > { %p4529_p2 = pnand %p4528_p3, %p4522_p1 }
  0x28   : > { %4532 = shalt.err (!%p4529_p2)
}
  0x29   : > { %4281 = dma.hbm_to_vmem [thread:$0]  (!%p4717_p12), %s5321_s2, 9216, %s275_s26, [#allocation7], %s4605_s28, %s4605_s28, %s4606_s29  }
  0x2a   : > { %316 = sbr.rel (%p4709_p10) target bundleno = 1001 (0x3e9), region = 56 }
  0x2f   : > { %p5338_p4 = scmp.eq.s32.totalorder %s4681_s13, 0 }
  0x31   : > { %4576 = dma.done.wait (%p5338_p4), [#allocation4], 9216   ;;  %p5339_p13 = pmov %p5338_p4 }
  0x32   : > { %p5340_p7 = pmov %p5338_p4 }
  0x33   : > { %4578 = vsyncadd (%p5339_p13), [#allocation4], 4294958080 }
  0x34   : > { %4580 = dma.done.wait (%p5340_p7), [#allocation7], 9216   ;;  %p5341_p6 = pmov %p5338_p4 }
  0x35   : > { %v4329_v0 = vld [vmem:[#allocation3 + $0x78] sm:$0xff]   ;;  %p355_p9 = scmp.lt.s32.totalorder %s4681_s13, 1  ;;  %v4331_v2 = vld [vmem:[#allocation3 + $0x70] sm:$0xff]   ;;  %v4333_v4 = vld [vmem:[#allocation3 + $0x68] sm:$0xff]   ;;  %vm4608_vm0 = vmmov 0   ;;  %s3584_s17 = sshll.u32 %s4681_s13, 4 }
  0x36   : > { %4582 = vsyncadd (%p5341_p6), [#allocation7], 4294958080  ;;  %v4330_v1 = vld [vmem:[#allocation3 + $0x38] sm:$0xff]   ;;  %3812 = vmatprep.subr.bf16.mxu0 %v4329_v0  ;;  %v4332_v3 = vld [vmem:[#allocation3 + $0x30] sm:$0xff]   ;;  %s5278_s24 = scalar_lea.hbm %s5328_s9, %s3584_s17 }
  0x37   : > { %3836 = vmatprep.subr.bf16.mxu1 %v4330_v1  ;;  %3813 = vmatpush3.bf16.msra.mxu0 %v4329_v0  ;;  %v4334_v5 = vld [vmem:[#allocation3 + $0x28] sm:$0xff]   ;;  %s356_s21 = scalar_select %p355_p9, %s4681_s13, 1  ;;  %v4335_v6 = vld [vmem:[#allocation3 + $0x60] sm:$0xff]   ;;  %v4337_v8 = vld [vmem:[#allocation3 + $0x58] sm:$0xff]  }
  0x38   : > { %3837 = vmatpush3.bf16.msra.mxu1 %v4330_v1  ;;  %3814 = vmatprep.subr.bf16.mxu0 %v4331_v2  ;;  %v4336_v7 = vld [vmem:[#allocation3 + $0x20] sm:$0xff]   ;;  %v4338_v9 = vld [vmem:[#allocation3 + $0x18] sm:$0xff]   ;;  %v4339_v10 = vld [vmem:[#allocation3 + $0x50] sm:$0xff]   ;;  %s4609_s13 = smov [#allocation8]  }
  0x39   : > { %3838 = vmatprep.subr.bf16.mxu1 %v4332_v3  ;;  %s4264_s23 = smul.u32 160, %s356_s21  ;;  %v4340_v14 = vld [vmem:[#allocation3 + $0x10] sm:$0xff]   ;;  %v4341_v18 = vld [vmem:[#allocation3 + $0x48] sm:$0xff]   ;;  %v4343_v20 = vld [vmem:[#allocation3 + $0x40] sm:$0xff]   ;;  %s4537_s29 = sshll.u32 %s4609_s13, 4  ;;  %s4538_s29 = int_to_ptr.vmem [resolvable:$false] %s4537_s29 }
  0x3a   : > { %v4342_v19 = vld [vmem:[#allocation3 + $0x8] sm:$0xff]   ;;  %v4344_v21 = vld [vmem:[#allocation3] sm:$0xff]   ;;  %v4345_v26 = vld [vmem:[#allocation3 + $0xb8] sm:$0xff]   ;;  %s4539_s14 = scalar_lea.vmem %s4538_s29, 32 }
  0x3b   : > { %3815 = vmatpush3.bf16.msra.mxu0 %v4331_v2  ;;  %s4754_s27 = scalar_lea.vmem %s5319_s0, %s4264_s23  ;;  %v4346_v27 = vld [vmem:[#allocation3 + $0xf8] sm:$0xff]   ;;  %v4347_v29 = vld [vmem:[#allocation3 + $0xb0] sm:$0xff]   ;;  %v4349_v38 = vld [vmem:[#allocation3 + $0xa8] sm:$0xff]  }
  0x3c   : > { %3839 = vmatpush3.bf16.msra.mxu1 %v4332_v3  ;;  %3816 = vmatprep.subr.bf16.mxu0 %v4333_v4  ;;  %v389_v11 = vld [vmem:[%s4754_s27 + $0x1] sm:$0xff]  ;;  %v4758_v12 = vld [vmem:[%s4754_s27 + $0x11] sm:$0xff] }
  0x3d   : > { %3840 = vmatprep.subr.bf16.mxu1 %v4334_v5  ;;  %v361_v13 = vld [vmem:[%s4754_s27] sm:$0xff]  ;;  %v397_v15 = vpack.c.bf16 %v4758_v12, %v389_v11  ;;  %v4763_v16 = vld [vmem:[%s4754_s27 + $0x10] sm:$0xff]  ;;  %v4350_v43 = vld [vmem:[#allocation3 + $0xe8] sm:$0xff]  }
  0x3e   : > { %v369_v17 = vpack.c.bf16 %v4763_v16, %v361_v13  ;;  %v4767_v22 = vld [vmem:[%s4754_s27 + $0x21] sm:$0xff]  ;;  %v4770_v23 = vld [vmem:[%s4754_s27 + $0x31] sm:$0xff] }
  0x3f   : > { %3817 = vmatpush3.bf16.msra.mxu0 %v4333_v4  ;;  %3828 = vmatprep.mubr.bf16.mxu0 %v397_v15  ;;  %v363_v24 = vld [vmem:[%s4754_s27 + $0x20] sm:$0xff]  ;;  %v4774_v25 = vld [vmem:[%s4754_s27 + $0x30] sm:$0xff]  ;;  %v4778_v28 = vpack.c.bf16 %v4770_v23, %v4767_v22  ;;  %v4353_v52 = vld [vmem:[#allocation3 + $0x98] sm:$0xff]  }
  0x40   : > { %3841 = vmatpush3.bf16.msra.mxu1 %v4334_v5  ;;  %3818 = vmatprep.subr.bf16.mxu0 %v4335_v6  ;;  %v4781_v30 = vld [vmem:[%s4754_s27 + $0x41] sm:$0xff]  ;;  %v4784_v31 = vld [vmem:[%s4754_s27 + $0x51] sm:$0xff]  ;;  %v4790_v33 = vpack.c.bf16 %v4774_v25, %v363_v24  ;;  %v803_v51 = vpack.c.bf16 %v363_v24, %v4763_v16 }
  0x41   : > { %3842 = vmatprep.subr.bf16.mxu1 %v4336_v7  ;;  %3852 = vmatprep.mubr.bf16.mxu1 %v369_v17  ;;  %v4787_v32 = vld [vmem:[%s4754_s27 + $0x40] sm:$0xff]  ;;  %v4793_v34 = vld [vmem:[%s4754_s27 + $0x50] sm:$0xff]  ;;  %v4797_v36 = vpack.c.bf16 %v4784_v31, %v4781_v30  ;;  %v4354_v53 = vld [vmem:[#allocation3 + $0xd8] sm:$0xff]  }
  0x42   : > { %v4348_v35 = vld [vmem:[#allocation3 + $0xf0] sm:$0xff]   ;;  %v4800_v37 = vld [vmem:[%s4754_s27 + $0x61] sm:$0xff]  ;;  %v4805_v39 = vpack.c.bf16 %v4793_v34, %v4787_v32  ;;  %v4361_v62 = vld [vmem:[#allocation3 + $0x138] sm:$0xff]   ;;  %v804_v3 = vpack.c.bf16 %v4787_v32, %v4774_v25 }
  0x43   : > { %3819 = vmatpush3.bf16.msra.mxu0 %v4335_v6  ;;  %v4808_v40 = vld [vmem:[%s4754_s27 + $0x71] sm:$0xff]  ;;  %v4812_v41 = vld [vmem:[%s4754_s27 + $0x60] sm:$0xff]  ;;  %v4357_v56 = vld [vmem:[#allocation3 + $0x88] sm:$0xff]  }
  0x44   : > { %3843 = vmatpush3.bf16.msra.mxu1 %v4336_v7  ;;  %3820 = vmatprep.subr.bf16.mxu0 %v4337_v8  ;;  %v4815_v42 = vld [vmem:[%s4754_s27 + $0x70] sm:$0xff]  ;;  %v4821_v44 = vpack.c.bf16 %v4808_v40, %v4800_v37  ;;  %v644_v45 = vld [vmem:[%s4754_s27 + $0x2] sm:$0xff]  ;;  %v4362_v63 = vld [vmem:[#allocation3 + $0x178] sm:$0xff]  }
  0x45   : > { %3844 = vmatprep.subr.bf16.mxu1 %v4338_v9  ;;  %v4825_v46 = vld [vmem:[%s4754_s27 + $0x12] sm:$0xff]  ;;  %v4829_v47 = vpack.c.bf16 %v4815_v42, %v4812_v41  ;;  %v4351_v48 = vld [vmem:[#allocation3 + $0xa0] sm:$0xff]   ;;  %v4358_v57 = vld [vmem:[#allocation3 + $0xc8] sm:$0xff]  }
  0x46   : > { %v4352_v49 = vld [vmem:[#allocation3 + $0xe0] sm:$0xff]   ;;  %v652_v50 = vpack.c.bf16 %v4825_v46, %v644_v45  ;;  %v4355_v54 = vld [vmem:[#allocation3 + $0x90] sm:$0xff]   ;;  %v4366_v13 = vld [vmem:[#allocation3 + $0x168] sm:$0xff]  }
  0x47   : > { %3821 = vmatpush3.bf16.msra.mxu0 %v4337_v8  ;;  %v4356_v55 = vld [vmem:[#allocation3 + $0xd0] sm:$0xff]   ;;  %v4359_v58 = vld [vmem:[#allocation3 + $0x80] sm:$0xff]   ;;  %v4378_v32 = vld [vmem:[#allocation3 + $0x1f8] sm:$0xff]  }
  0x48   : > { %3845 = vmatpush3.bf16.msra.mxu1 %v4338_v9  ;;  %3822 = vmatprep.subr.bf16.mxu0 %v4339_v10  ;;  %v4360_v59 = vld [vmem:[#allocation3 + $0xc0] sm:$0xff]   ;;  %v4837_v61 = vld [vmem:[%s4754_s27 + $0x32] sm:$0xff]  ;;  %v805_v9 = vpack.c.bf16 %v4812_v41, %v4793_v34  ;;  %v954_v34 = vpack.c.bf16 %v4781_v30, %v4770_v23  ;;  %v4381_v45 = vld [vmem:[#allocation3 + $0x1a8] sm:$0xff]  }
  0x49   : > { %3846 = vmatprep.subr.bf16.mxu1 %v4340_v14  ;;  %v646_v60 = vld [vmem:[%s4754_s27 + $0x22] sm:$0xff]  ;;  %v4846_v2 = vld [vmem:[%s4754_s27 + $0x52] sm:$0xff] }
  0x4a   : > { %v4840_v0 = vld [vmem:[%s4754_s27 + $0x42] sm:$0xff]  ;;  %v4843_v1 = vpack.c.bf16 %v4837_v61, %v646_v60  ;;  %v4363_v4 = vld [vmem:[#allocation3 + $0x130] sm:$0xff]  }
  0x4b   : > { %3823 = vmatpush3.bf16.msra.mxu0 %v4339_v10  ;;  %v4364_v5 = vld [vmem:[#allocation3 + $0x170] sm:$0xff]   ;;  %v4852_v6 = vpack.c.bf16 %v4846_v2, %v4840_v0  ;;  %v4855_v7 = vld [vmem:[%s4754_s27 + $0x62] sm:$0xff] }
  0x4c   : > { %3847 = vmatpush3.bf16.msra.mxu1 %v4340_v14  ;;  %3824 = vmatprep.subr.bf16.mxu0 %v4341_v18  ;;  %v4859_v8 = vld [vmem:[%s4754_s27 + $0x72] sm:$0xff]  ;;  %v4365_v10 = vld [vmem:[#allocation3 + $0x128] sm:$0xff]   ;;  %v4864_v11 = vld [vmem:[%s4754_s27 + $0x80] sm:$0xff] }
  0x4d   : > { %3848 = vmatprep.subr.bf16.mxu1 %v4342_v19  ;;  %v4869_v14 = vpack.c.bf16 %v4859_v8, %v4855_v7  ;;  %v806_v15 = vpack.c.bf16 %v4864_v11, %v4815_v42  ;;  %v4367_v16 = vld [vmem:[#allocation3 + $0x120] sm:$0xff]   ;;  %v4371_v24 = vld [vmem:[#allocation3 + $0x110] sm:$0xff]   ;;  %v955_v42 = vpack.c.bf16 %v4800_v37, %v4784_v31  ;;  %v4382_v30 = vld [vmem:[#allocation3 + $0x1e8] sm:$0xff]  }
  0x4e   : > { %v4368_v17 = vld [vmem:[#allocation3 + $0x160] sm:$0xff]   ;;  %v4372_v25 = vld [vmem:[#allocation3 + $0x150] sm:$0xff]  }
  0x4f   : > { %3825 = vmatpush3.bf16.msra.mxu0 %v4341_v18  ;;  %v953_v18 = vpack.c.bf16 %v4767_v22, %v4758_v12  ;;  %v4373_v12 = vld [vmem:[#allocation3 + $0x108] sm:$0xff]   ;;  %v4380_v41 = vld [vmem:[#allocation3 + $0x1f0] sm:$0xff]   ;;  %v4383_v31 = vld [vmem:[#allocation3 + $0x1a0] sm:$0xff]  }
  0x50   : > { %3849 = vmatpush3.bf16.msra.mxu1 %v4342_v19  ;;  %3826 = vmatprep.subr.bf16.mxu0 %v4343_v20  ;;  %v1103_v19 = vpack.c.bf16 %v646_v60, %v4825_v46  ;;  %v4374_v22 = vld [vmem:[#allocation3 + $0x148] sm:$0xff]   ;;  %v1105_v46 = vpack.c.bf16 %v4855_v7, %v4846_v2  ;;  %v4402_v2 = vld [vmem:[#allocation6 + $0x38] sm:$0xff]  }
  0x51   : > { %3850 = vmatprep.subr.bf16.mxu1 %v4344_v21  ;;  %v4889_v23 = vld [vmem:[%s4754_s27 + $0x82] sm:$0xff] }
  0x52   : > { %v1106_v37 = vpack.c.bf16 %v4889_v23, %v4859_v8  ;;  %v4406_v7 = vld [vmem:[#allocation6 + $0x28] sm:$0xff]   ;;  %v4409_v8 = vld [vmem:[#allocation6 + $0x58] sm:$0xff]  }
  0x53   : > { %3827 = vmatpush3.bf16.msra.mxu0 %v4343_v20  ;;  %v4369_v20 = vld [vmem:[#allocation3 + $0x118] sm:$0xff]  }
  0x54   : > { %3851 = vmatpush3.bf16.msra.mxu1 %v4344_v21  ;;  %3860 = vmatprep.subr.bf16.mxu0 %v4345_v26  ;;  %v4370_v21 = vld [vmem:[#allocation3 + $0x158] sm:$0xff]  }
  0x55   : > { %3884 = vmatprep.subr.bf16.mxu1 %v4346_v27 }
  0x56   : > { %3829 = vmatmul.mubr.bf16.vlgmr.msra.gmra.mxu0 %v4778_v28 }
  0x57   : > { %3853 = vmatmul.mubr.bf16.vlgmr.msra.gmra.mxu1 %v4790_v33  ;;  %3861 = vmatpush3.bf16.msra.mxu0 %v4345_v26  ;;  %v4375_v26 = vld [vmem:[#allocation3 + $0x100] sm:$0xff]  }
  0x58   : > { %3885 = vmatpush3.bf16.msra.mxu1 %v4346_v27  ;;  %3862 = vmatprep.subr.bf16.mxu0 %v4347_v29  ;;  %v4376_v27 = vld [vmem:[#allocation3 + $0x140] sm:$0xff]  }
  0x59   : > { %3886 = vmatprep.subr.bf16.mxu1 %v4348_v35  ;;  %3832 = vmatprep.mubr.bf16.mxu0 %v4797_v36 }
  0x5a   : > { %3856 = vmatprep.mubr.bf16.mxu1 %v4805_v39 }
  0x5b   : > { %3863 = vmatpush3.bf16.msra.mxu0 %v4347_v29  ;;  %v4377_v29 = vld [vmem:[#allocation3 + $0x1b8] sm:$0xff]  }
  0x5c   : > { %3887 = vmatpush3.bf16.msra.mxu1 %v4348_v35  ;;  %3864 = vmatprep.subr.bf16.mxu0 %v4349_v38  ;;  %v4379_v35 = vld [vmem:[#allocation3 + $0x1b0] sm:$0xff]  }
  0x5d   : > { %3888 = vmatprep.subr.bf16.mxu1 %v4350_v43 }
  0x5e   : > { %3833 = vmatmul.mubr.bf16.gmra.mxu0 %v4821_v44 }
  0x5f   : > { %3865 = vmatpush3.bf16.msra.mxu0 %v4349_v38  ;;  %3857 = vmatmul.mubr.bf16.gmra.mxu1 %v4829_v47  ;;  %v1104_v38 = vpack.c.bf16 %v4840_v0, %v4837_v61 }
  0x60   : > { %3889 = vmatpush3.bf16.msra.mxu1 %v4350_v43  ;;  %3866 = vmatprep.subr.bf16.mxu0 %v4351_v48  ;;  %v4884_v43 = vld [vmem:[%s4754_s27 + $0x81] sm:$0xff] }
  0x61   : > { %3890 = vmatprep.subr.bf16.mxu1 %v4352_v49  ;;  %3876 = vmatprep.mubr.bf16.mxu0 %v652_v50  ;;  %v4385_v50 = vld [vmem:[#allocation3 + $0x198] sm:$0xff]  }
  0x62   : > { %3900 = vmatprep.mubr.bf16.mxu1 %v803_v51  ;;  %v4386_v51 = vld [vmem:[#allocation3 + $0x1d8] sm:$0xff]  }
  0x63   : > { %3867 = vmatpush3.bf16.msra.mxu0 %v4351_v48  ;;  %v956_v48 = vpack.c.bf16 %v4884_v43, %v4808_v40  ;;  %v4387_v40 = vld [vmem:[#allocation3 + $0x190] sm:$0xff]  }
  0x64   : > { %3891 = vmatpush3.bf16.msra.mxu1 %v4352_v49  ;;  %3868 = vmatprep.subr.bf16.mxu0 %v4353_v52  ;;  %v4384_v49 = vld [vmem:[#allocation3 + $0x1e0] sm:$0xff]  }
  0x65   : > { %3892 = vmatprep.subr.bf16.mxu1 %v4354_v53 }
  0x67   : > { %3869 = vmatpush3.bf16.msra.mxu0 %v4353_v52  ;;  %v4388_v52 = vld [vmem:[#allocation3 + $0x1d0] sm:$0xff]  }
  0x68   : > { %3893 = vmatpush3.bf16.msra.mxu1 %v4354_v53  ;;  %3870 = vmatprep.subr.bf16.mxu0 %v4355_v54  ;;  %v4389_v53 = vld [vmem:[#allocation3 + $0x188] sm:$0xff]  }
  0x69   : > { %3894 = vmatprep.subr.bf16.mxu1 %v4356_v55 }
  0x6b   : > { %3871 = vmatpush3.bf16.msra.mxu0 %v4355_v54  ;;  %v4390_v54 = vld [vmem:[#allocation3 + $0x1c8] sm:$0xff]  }
  0x6c   : > { %3895 = vmatpush3.bf16.msra.mxu1 %v4356_v55  ;;  %3872 = vmatprep.subr.bf16.mxu0 %v4357_v56  ;;  %v4391_v55 = vld [vmem:[#allocation3 + $0x180] sm:$0xff]  }
  0x6d   : > { %3896 = vmatprep.subr.bf16.mxu1 %v4358_v57 }
  0x6f   : > { %3873 = vmatpush3.bf16.msra.mxu0 %v4357_v56  ;;  %v4392_v56 = vld [vmem:[#allocation3 + $0x1c0] sm:$0xff]  }
  0x70   : > { %3897 = vmatpush3.bf16.msra.mxu1 %v4358_v57  ;;  %3874 = vmatprep.subr.bf16.mxu0 %v4359_v58  ;;  %v3451_v57 = vld [vmem:[%s4754_s27 + $0x90] sm:$0xff] }
  0x71   : > { %3898 = vmatprep.subr.bf16.mxu1 %v4360_v59  ;;  %v1257_v60 = vpack.c.bf16 %v3451_v57, %v4864_v11  ;;  %v5330_v11 = vmov 0.0  }
  0x72   : > { %1740 = vst [vmem:[#allocation2 + $0x30] sm:$0xff] %v5330_v11  ;;  %1741 = vst [vmem:[#allocation2 + $0x38] sm:$0x3] %v5330_v11 }
  0x73   : > { %3875 = vmatpush3.bf16.msra.mxu0 %v4359_v58  ;;  %v4395_v58 = vld [vmem:[#allocation3 + $0x228] sm:$0xff]   ;;  %1734 = vst [vmem:[#allocation2] sm:$0xff] %v5330_v11  ;;  %1735 = vst [vmem:[#allocation2 + $0x8] sm:$0x3] %v5330_v11 }
  0x74   : > { %3899 = vmatpush3.bf16.msra.mxu1 %v4360_v59  ;;  %3908 = vmatprep.subr.bf16.mxu0 %v4361_v62  ;;  %v3467_v59 = vld [vmem:[%s4754_s27 + $0x91] sm:$0xff]  ;;  %1736 = vst [vmem:[#allocation2 + $0x10] sm:$0xff] %v5330_v11  ;;  %1737 = vst [vmem:[#allocation2 + $0x18] sm:$0x3] %v5330_v11 }
  0x75   : > { %3932 = vmatprep.subr.bf16.mxu1 %v4362_v63  ;;  %v1407_v61 = vpack.c.bf16 %v3467_v59, %v4884_v43  ;;  %1738 = vst [vmem:[#allocation2 + $0x20] sm:$0xff] %v5330_v11  ;;  %1739 = vst [vmem:[#allocation2 + $0x28] sm:$0x3] %v5330_v11 }
  0x76   : > { %3877 = vmatmul.mubr.bf16.vlgmr.msra.gmra.mxu0 %v4843_v1  ;;  %1742 = vst [vmem:[#allocation2 + $0x40] sm:$0xff] %v5330_v11  ;;  %1743 = vst [vmem:[#allocation2 + $0x48] sm:$0x3] %v5330_v11 }
  0x77   : > { %3909 = vmatpush3.bf16.msra.mxu0 %v4361_v62  ;;  %3901 = vmatmul.mubr.bf16.vlgmr.msra.gmra.mxu1 %v804_v3  ;;  %v4396_v62 = vld [vmem:[#allocation3 + $0x220] sm:$0xff]   ;;  %v4403_v3 = vld [vmem:[#allocation6 + $0x70] sm:$0xff]   ;;  %1744 = vst [vmem:[#allocation2 + $0x50] sm:$0xff] %v5330_v11  ;;  %1745 = vst [vmem:[#allocation2 + $0x58] sm:$0x3] %v5330_v11 }
  0x78   : > { %3933 = vmatpush3.bf16.msra.mxu1 %v4362_v63  ;;  %3910 = vmatprep.subr.bf16.mxu0 %v4363_v4  ;;  %v3483_v63 = vld [vmem:[%s4754_s27 + $0x92] sm:$0xff]  ;;  %1746 = vst [vmem:[#allocation2 + $0x60] sm:$0xff] %v5330_v11  ;;  %1747 = vst [vmem:[#allocation2 + $0x68] sm:$0x3] %v5330_v11 }
  0x79   : > { %3934 = vmatprep.subr.bf16.mxu1 %v4364_v5  ;;  %3880 = vmatprep.mubr.bf16.mxu0 %v4852_v6  ;;  %v1557_v0 = vpack.c.bf16 %v3483_v63, %v4889_v23  ;;  %1748 = vst [vmem:[#allocation2 + $0x70] sm:$0xff] %v5330_v11  ;;  %1749 = vst [vmem:[#allocation2 + $0x78] sm:$0x3] %v5330_v11 }
  0x7a   : > { %3904 = vmatprep.mubr.bf16.mxu1 %v805_v9  ;;  %v4408_v9 = vld [vmem:[#allocation6 + $0x20] sm:$0xff]   ;;  %1750 = vst [vmem:[#allocation2 + $0x80] sm:$0xff] %v5330_v11  ;;  %1751 = vst [vmem:[#allocation2 + $0x88] sm:$0x3] %v5330_v11 }
  0x7b   : > { %3911 = vmatpush3.bf16.msra.mxu0 %v4363_v4  ;;  %v4404_v4 = vld [vmem:[#allocation6 + $0x30] sm:$0xff]   ;;  %1752 = vst [vmem:[#allocation2 + $0x90] sm:$0xff] %v5330_v11  ;;  %1753 = vst [vmem:[#allocation2 + $0x98] sm:$0x3] %v5330_v11 }
  0x7c   : > { %3935 = vmatpush3.bf16.msra.mxu1 %v4364_v5  ;;  %3912 = vmatprep.subr.bf16.mxu0 %v4365_v10  ;;  %v4405_v5 = vld [vmem:[#allocation6 + $0x68] sm:$0xff]  }
  0x7d   : > { %3936 = vmatprep.subr.bf16.mxu1 %v4366_v13 }
  0x7e   : > { %3881 = vmatmul.mubr.bf16.gmra.mxu0 %v4869_v14 }
  0x7f   : > { %3913 = vmatpush3.bf16.msra.mxu0 %v4365_v10  ;;  %3905 = vmatmul.mubr.bf16.gmra.mxu1 %v806_v15  ;;  %v4411_v10 = vld [vmem:[#allocation6 + $0x50] sm:$0xff]  }
  0x80   : > { %3937 = vmatpush3.bf16.msra.mxu1 %v4366_v13  ;;  %3914 = vmatprep.subr.bf16.mxu0 %v4367_v16  ;;  %v4410_v13 = vld [vmem:[#allocation6 + $0x18] sm:$0xff]  }
  0x81   : > { %3938 = vmatprep.subr.bf16.mxu1 %v4368_v17  ;;  %3924 = vmatprep.mubr.bf16.mxu0 %v953_v18 }
  0x82   : > { %3948 = vmatprep.mubr.bf16.mxu1 %v1103_v19  ;;  %v4414_v19 = vld [vmem:[#allocation6 + $0x8] sm:$0xff]  }
  0x83   : > { %3915 = vmatpush3.bf16.msra.mxu0 %v4367_v16  ;;  %v4412_v16 = vld [vmem:[#allocation6 + $0x10] sm:$0xff]  }
  0x84   : > { %3939 = vmatpush3.bf16.msra.mxu1 %v4368_v17  ;;  %3916 = vmatprep.subr.bf16.mxu0 %v4369_v20  ;;  %v4415_v17 = vld [vmem:[#allocation6 + $0x40] sm:$0xff]  }
  0x85   : > { %3940 = vmatprep.subr.bf16.mxu1 %v4370_v21 }
  0x87   : > { %3917 = vmatpush3.bf16.msra.mxu0 %v4369_v20  ;;  %v4934_v20 = vld [vmem:[#allocation6 + $0xb8] sm:$0xff]  }
  0x88   : > { %3941 = vmatpush3.bf16.msra.mxu1 %v4370_v21  ;;  %3918 = vmatprep.subr.bf16.mxu0 %v4371_v24  ;;  %5342 = vst [vmem:[#allocation12_spill] sm:$0xff] %v4934_v20 }
  0x89   : > { %3942 = vmatprep.subr.bf16.mxu1 %v4372_v25 }
  0x8b   : > { %3919 = vmatpush3.bf16.msra.mxu0 %v4371_v24  ;;  %v4416_v24 = vld [vmem:[#allocation6] sm:$0xff]  }
  0x8c   : > { %3943 = vmatpush3.bf16.msra.mxu1 %v4372_v25  ;;  %3920 = vmatprep.subr.bf16.mxu0 %v4373_v12 }
  0x8d   : > { %3944 = vmatprep.subr.bf16.mxu1 %v4374_v22 }
  0x8f   : > { %3921 = vmatpush3.bf16.msra.mxu0 %v4373_v12 }
  0x90   : > { %3945 = vmatpush3.bf16.msra.mxu1 %v4374_v22  ;;  %3922 = vmatprep.subr.bf16.mxu0 %v4375_v26  ;;  %v4937_v22 = vld [vmem:[#allocation6 + $0xf8] sm:$0xff]  }
  0x91   : > { %3946 = vmatprep.subr.bf16.mxu1 %v4376_v27  ;;  %5343 = vst [vmem:[#allocation13_spill] sm:$0xff] %v4937_v22 }
  0x93   : > { %3923 = vmatpush3.bf16.msra.mxu0 %v4375_v26 }
  0x94   : > { %3947 = vmatpush3.bf16.msra.mxu1 %v4376_v27  ;;  %3956 = vmatprep.subr.bf16.mxu0 %v4377_v29 }
  0x95   : > { %3980 = vmatprep.subr.bf16.mxu1 %v4378_v32 }
  0x96   : > { %3925 = vmatmul.mubr.bf16.vlgmr.msra.gmra.mxu0 %v954_v34 }
  0x97   : > { %3957 = vmatpush3.bf16.msra.mxu0 %v4377_v29  ;;  %3949 = vmatmul.mubr.bf16.vlgmr.msra.gmra.mxu1 %v1104_v38 }
  0x98   : > { %3981 = vmatpush3.bf16.msra.mxu1 %v4378_v32  ;;  %3958 = vmatprep.subr.bf16.mxu0 %v4379_v35 }
  0x99   : > { %3982 = vmatprep.subr.bf16.mxu1 %v4380_v41  ;;  %3928 = vmatprep.mubr.bf16.mxu0 %v955_v42 }
  0x9a   : > { %3952 = vmatprep.mubr.bf16.mxu1 %v1105_v46 }
  0x9b   : > { %3959 = vmatpush3.bf16.msra.mxu0 %v4379_v35 }
  0x9c   : > { %3983 = vmatpush3.bf16.msra.mxu1 %v4380_v41  ;;  %3960 = vmatprep.subr.bf16.mxu0 %v4381_v45 }
  0x9d   : > { %3984 = vmatprep.subr.bf16.mxu1 %v4382_v30 }
  0x9e   : > { %3929 = vmatmul.mubr.bf16.gmra.mxu0 %v956_v48 }
  0x9f   : > { %3961 = vmatpush3.bf16.msra.mxu0 %v4381_v45  ;;  %3953 = vmatmul.mubr.bf16.gmra.mxu1 %v1106_v37 }
  0xa0   : > { %3985 = vmatpush3.bf16.msra.mxu1 %v4382_v30  ;;  %3962 = vmatprep.subr.bf16.mxu0 %v4383_v31 }
  0xa1   : > { %3986 = vmatprep.subr.bf16.mxu1 %v4384_v49  ;;  %3972 = vmatprep.mubr.bf16.mxu0 %v4790_v33  ;;  %v4394_v33 = vld [vmem:[#allocation3 + $0x230] sm:$0xff]  }
  0xa2   : > { %3996 = vmatprep.mubr.bf16.mxu1 %v4778_v28  ;;  %v4393_v28 = vld [vmem:[#allocation3 + $0x238] sm:$0xff]  }
  0xa3   : > { %3963 = vmatpush3.bf16.msra.mxu0 %v4383_v31 }
  0xa4   : > { %3987 = vmatpush3.bf16.msra.mxu1 %v4384_v49  ;;  %3964 = vmatprep.subr.bf16.mxu0 %v4385_v50 }
  0xa5   : > { %3988 = vmatprep.subr.bf16.mxu1 %v4386_v51 }
  0xa7   : > { %3965 = vmatpush3.bf16.msra.mxu0 %v4385_v50 }
  0xa8   : > { %3989 = vmatpush3.bf16.msra.mxu1 %v4386_v51  ;;  %3966 = vmatprep.subr.bf16.mxu0 %v4387_v40 }
  0xa9   : > { %3990 = vmatprep.subr.bf16.mxu1 %v4388_v52 }
  0xab   : > { %3967 = vmatpush3.bf16.msra.mxu0 %v4387_v40 }
  0xac   : > { %3991 = vmatpush3.bf16.msra.mxu1 %v4388_v52  ;;  %3968 = vmatprep.subr.bf16.mxu0 %v4389_v53 }
  0xad   : > { %3992 = vmatprep.subr.bf16.mxu1 %v4390_v54 }
  0xaf   : > { %3969 = vmatpush3.bf16.msra.mxu0 %v4389_v53 }
  0xb0   : > { %3993 = vmatpush3.bf16.msra.mxu1 %v4390_v54  ;;  %3970 = vmatprep.subr.bf16.mxu0 %v4391_v55 }
  0xb1   : > { %3994 = vmatprep.subr.bf16.mxu1 %v4392_v56 }
  0xb3   : > { %3971 = vmatpush3.bf16.msra.mxu0 %v4391_v55 }
  0xb4   : > { %3995 = vmatpush3.bf16.msra.mxu1 %v4392_v56  ;;  %4004 = vmatprep.subr.bf16.mxu0 %v4393_v28 }
  0xb6   : > { %3973 = vmatmul.mubr.bf16.vlgmr.msra.gmra.mxu0 %v4805_v39  ;;  %v4397_v39 = vld [vmem:[#allocation3 + $0x218] sm:$0xff]  }
  0xb7   : > { %4005 = vmatpush3.bf16.msra.mxu0 %v4393_v28  ;;  %3997 = vmatmul.mubr.bf16.vlgmr.msra.gmra.mxu1 %v4797_v36  ;;  %v4398_v36 = vld [vmem:[#allocation3 + $0x210] sm:$0xff]  }
  0xb8   : > { %4006 = vmatprep.subr.bf16.mxu0 %v4394_v33  ;;  %3976 = vmatprep.mubr.bf16.mxu0 %v4829_v47  ;;  %v4400_v47 = vld [vmem:[#allocation3 + $0x200] sm:$0xff]  }
  0xb9   : > { %4000 = vmatprep.mubr.bf16.mxu1 %v4821_v44  ;;  %v4399_v44 = vld [vmem:[#allocation3 + $0x208] sm:$0xff]  }
  0xbb   : > { %4007 = vmatpush3.bf16.msra.mxu0 %v4394_v33 }
  0xbc   : > { %4008 = vmatprep.subr.bf16.mxu0 %v4395_v58 }
  0xbe   : > { %3977 = vmatmul.mubr.bf16.gmra.mxu0 %v1257_v60 }
  0xbf   : > { %4009 = vmatpush3.bf16.msra.mxu0 %v4395_v58  ;;  %4001 = vmatmul.mubr.bf16.gmra.mxu1 %v1407_v61 }
  0xc0   : > { %4010 = vmatprep.subr.bf16.mxu0 %v4396_v62  ;;  %4020 = vmatprep.mubr.bf16.mxu0 %v4843_v1  ;;  %v4401_v1 = vld [vmem:[#allocation6 + $0x78] sm:$0xff]  }
  0xc1   : > { %4028 = vmatprep.subr.bf16.mxu1 %v4401_v1 }
  0xc2   : > { %4029 = vmatpush3.bf16.msra.mxu1 %v4401_v1 }
  0xc3   : > { %4011 = vmatpush3.bf16.msra.mxu0 %v4396_v62  ;;  %4030 = vmatprep.subr.bf16.mxu1 %v4403_v3 }
  0xc4   : > { %4012 = vmatprep.subr.bf16.mxu0 %v4397_v39 }
  0xc6   : > { %4031 = vmatpush3.bf16.msra.mxu1 %v4403_v3 }
  0xc7   : > { %4013 = vmatpush3.bf16.msra.mxu0 %v4397_v39  ;;  %4032 = vmatprep.subr.bf16.mxu1 %v4405_v5 }
  0xc8   : > { %4014 = vmatprep.subr.bf16.mxu0 %v4398_v36 }
  0xca   : > { %4033 = vmatpush3.bf16.msra.mxu1 %v4405_v5 }
  0xcb   : > { %4015 = vmatpush3.bf16.msra.mxu0 %v4398_v36 }
  0xcc   : > { %4016 = vmatprep.subr.bf16.mxu0 %v4399_v44 }
  0xcf   : > { %4017 = vmatpush3.bf16.msra.mxu0 %v4399_v44 }
  0xd0   : > { %4018 = vmatprep.subr.bf16.mxu0 %v4400_v47 }
  0xd3   : > { %4019 = vmatpush3.bf16.msra.mxu0 %v4400_v47 }
  0xd4   : > { %4052 = vmatprep.subr.bf16.mxu0 %v4402_v2 }
  0xd6   : > { %4021 = vmatmul.mubr.bf16.vlgmr.msra.gmra.mxu0 %v4852_v6  ;;  %v4407_v6 = vld [vmem:[#allocation6 + $0x60] sm:$0xff]  }
  0xd7   : > { %4024 = vmatprep.mubr.bf16.mxu0 %v4869_v14  ;;  %4053 = vmatpush3.bf16.msra.mxu0 %v4402_v2  ;;  %v4413_v14 = vld [vmem:[#allocation6 + $0x48] sm:$0xff]  }
  0xd8   : > { %4054 = vmatprep.subr.bf16.mxu0 %v4404_v4  ;;  %4034 = vmatprep.subr.bf16.mxu1 %v4407_v6 }
  0xd9   : > { %4035 = vmatpush3.bf16.msra.mxu1 %v4407_v6 }
  0xda   : > { %4036 = vmatprep.subr.bf16.mxu1 %v4409_v8 }
  0xdb   : > { %4055 = vmatpush3.bf16.msra.mxu0 %v4404_v4 }
  0xdc   : > { %4056 = vmatprep.subr.bf16.mxu0 %v4406_v7 }
  0xdd   : > { %4037 = vmatpush3.bf16.msra.mxu1 %v4409_v8 }
  0xde   : > { %4025 = vmatmul.mubr.bf16.gmra.mxu0 %v1557_v0  ;;  %4038 = vmatprep.subr.bf16.mxu1 %v4411_v10 }
  0xdf   : > { %4057 = vmatpush3.bf16.msra.mxu0 %v4406_v7 }
  0xe0   : > { %4058 = vmatprep.subr.bf16.mxu0 %v4408_v9 }
  0xe1   : > { %4039 = vmatpush3.bf16.msra.mxu1 %v4411_v10 }
  0xe2   : > { %4040 = vmatprep.subr.bf16.mxu1 %v4413_v14 }
  0xe3   : > { %4059 = vmatpush3.bf16.msra.mxu0 %v4408_v9 }
  0xe4   : > { %4060 = vmatprep.subr.bf16.mxu0 %v4410_v13 }
  0xe5   : > { %4041 = vmatpush3.bf16.msra.mxu1 %v4413_v14 }
  0xe6   : > { %4042 = vmatprep.subr.bf16.mxu1 %v4415_v17 }
  0xe7   : > { %4061 = vmatpush3.bf16.msra.mxu0 %v4410_v13 }
  0xe8   : > { %4062 = vmatprep.subr.bf16.mxu0 %v4412_v16 }
  0xe9   : > { %4043 = vmatpush3.bf16.msra.mxu1 %v4415_v17 }
  0xea   : > { %4076 = vmatprep.subr.bf16.mxu1 %v4934_v20 }
  0xeb   : > { %4063 = vmatpush3.bf16.msra.mxu0 %v4412_v16 }
  0xec   : > { %4064 = vmatprep.subr.bf16.mxu0 %v4414_v19 }
  0xef   : > { %4065 = vmatpush3.bf16.msra.mxu0 %v4414_v19 }
  0xf0   : > { %4066 = vmatprep.subr.bf16.mxu0 %v4416_v24 }
  0xf3   : > { %4067 = vmatpush3.bf16.msra.mxu0 %v4416_v24 }
  0xf4   : > { %4100 = vmatprep.subr.bf16.mxu0 %v4937_v22 }
 0x116   : > { %v4930_v15 = vpop.f32.mrf.mxu0 }
 0x117   : > { %v3854_v25 = vpop.f32.mrf.mxu1 }
 0x118   : > { %v4932_v18 = vpop.f32.mrf.mxu0  ;;  %v622_v7 = vadd.f32 %v3854_v25, %v4930_v15 }
 0x119   : > { %v613_v27 = vpop.f32.mrf.mxu1 }
 0x11a   : > { %v3831_v21 = vpop.f32.mrf.mxu0  ;;  %v614_v10 = vadd.f32 %v613_v27, %v4932_v18 }
 0x11b   : > { %v3855_v32 = vpop.f32.mrf.mxu1 }
 0x11c   : > { %v503_v12 = vpop.f32.mrf.mxu0  ;;  %v625_v14 = vadd.f32 %v3855_v32, %v3831_v21 }
 0x11d   : > { %v616_v35 = vpop.f32.mrf.mxu1 }
 0x11e   : > { %v3834_v26 = vpop.f32.mrf.mxu0  ;;  %v617_v24 = vadd.f32 %v616_v35, %v503_v12 }
 0x11f   : > { %v3858_v38 = vpop.f32.mrf.mxu1 }
 0x120   : > { %v516_v29 = vpop.f32.mrf.mxu0  ;;  %v638_v20 = vadd.f32 %v3858_v38, %v3834_v26 }
 0x121   : > { %v629_v43 = vpop.f32.mrf.mxu1 }
 0x122   : > { %v4940_v34 = vpop.f32.mrf.mxu0 }
 0x123   : > { %5344 = vst [vmem:[#allocation14_spill] sm:$0xff] %v4940_v34  ;;  %v3859_v46 = vpop.f32.mrf.mxu1 }
 0x124   : > { %v4942_v41 = vpop.f32.mrf.mxu0 }
 0x125   : > { %5345 = vst [vmem:[#allocation15_spill] sm:$0xff] %v4942_v41  ;;  %v632_v30 = vpop.f32.mrf.mxu1 }
 0x12a   : > { %v5350_v27 = vld [vmem:[#allocation14_spill] sm:$0xff] }
 0x12c   : > { %v5351_v12 = vld [vmem:[#allocation15_spill] sm:$0xff] }
 0x12d   : > { %v633_v35 = vadd.f32 %v632_v30, %v5351_v12 }
 0x136   : > { %v3878_v42 = vpop.f32.mrf.mxu0 }
 0x137   : > { %v3902_v48 = vpop.f32.mrf.mxu1  ;;  %v788_v13 = vadd.f32 %v3878_v42, %v622_v7  ;;  %v641_v7 = vadd.f32 %v3859_v46, %v5350_v27 }
 0x138   : > { %v755_v45 = vpop.f32.mrf.mxu0 }
 0x139   : > { %v906_v37 = vpop.f32.mrf.mxu1  ;;  %v786_v16 = vadd.f32 %v755_v45, %v614_v10  ;;  %v939_v11 = vadd.f32 %v3902_v48, %v788_v13 }
 0x13a   : > { %v3879_v23 = vpop.f32.mrf.mxu0 }
 0x13b   : > { %v3903_v50 = vpop.f32.mrf.mxu1  ;;  %v789_v22 = vadd.f32 %v3879_v23, %v625_v14 }
 0x13c   : > { %v758_v31 = vpop.f32.mrf.mxu0 }
 0x13d   : > { %v909_v40 = vpop.f32.mrf.mxu1  ;;  %v940_v25 = vadd.f32 %v3903_v50, %v789_v22 }
 0x13e   : > { %v3882_v49 = vpop.f32.mrf.mxu0 }
 0x13f   : > { %v3906_v53 = vpop.f32.mrf.mxu1  ;;  %v792_v34 = vadd.f32 %v3882_v49, %v638_v20 }
 0x140   : > { %v771_v51 = vpop.f32.mrf.mxu0 }
 0x141   : > { %v922_v56 = vpop.f32.mrf.mxu1  ;;  %v943_v23 = vadd.f32 %v3906_v53, %v792_v34 }
 0x142   : > { %v3883_v52 = vpop.f32.mrf.mxu0 }
 0x143   : > { %v3907_v33 = vpop.f32.mrf.mxu1  ;;  %v793_v26 = vadd.f32 %v3883_v52, %v641_v7 }
 0x144   : > { %v774_v54 = vpop.f32.mrf.mxu0 }
 0x145   : > { %v4944_v58 = vpop.f32.mrf.mxu1  ;;  %v791_v20 = vadd.f32 %v774_v54, %v633_v35  ;;  %v944_v46 = vadd.f32 %v3907_v33, %v793_v26  ;;  %v1791_v35 = vld [vmem:[#allocation2 + $0x1] sm:$0xff] }
 0x146   : > { %5346 = vst [vmem:[#allocation16_spill] sm:$0xff] %v4944_v58 }
 0x156   : > { %v3926_v55 = vpop.f32.mrf.mxu0 }
 0x157   : > { %v3950_v59 = vpop.f32.mrf.mxu1  ;;  %v1089_v58 = vadd.f32 %v3926_v55, %v939_v11 }
 0x158   : > { %v1056_v28 = vpop.f32.mrf.mxu0 }
 0x159   : > { %v1206_v61 = vpop.f32.mrf.mxu1  ;;  %v1239_v32 = vadd.f32 %v3950_v59, %v1089_v58 }
 0x15a   : > { %v3927_v57 = vpop.f32.mrf.mxu0 }
 0x15b   : > { %v3951_v39 = vpop.f32.mrf.mxu1  ;;  %v1090_v45 = vadd.f32 %v3927_v57, %v940_v25  ;;  %v5352_v57 = vld [vmem:[#allocation16_spill] sm:$0xff] }
 0x15c   : > { %v1059_v60 = vpop.f32.mrf.mxu0  ;;  %v942_v30 = vadd.f32 %v5352_v57, %v791_v20 }
 0x15d   : > { %v1209_v44 = vpop.f32.mrf.mxu1  ;;  %v1240_v22 = vadd.f32 %v3951_v39, %v1090_v45 }
 0x15e   : > { %v3930_v62 = vpop.f32.mrf.mxu0 }
 0x15f   : > { %v3954_v63 = vpop.f32.mrf.mxu1 }
 0x160   : > { %v1072_v36 = vpop.f32.mrf.mxu0 }
 0x161   : > { %v1222_v2 = vpop.f32.mrf.mxu1 }
 0x162   : > { %v3931_v47 = vpop.f32.mrf.mxu0 }
 0x163   : > { %v4948_v4 = vpop.f32.mrf.mxu1  ;;  %v1094_v52 = vadd.f32 %v3931_v47, %v944_v46 }
 0x164   : > { %v4946_v0 = vpop.f32.mrf.mxu0  ;;  %5348 = vst [vmem:[#allocation18_spill] sm:$0xff] %v4948_v4  ;;  %v787_v4 = vadd.f32 %v758_v31, %v617_v24 }
 0x165   : > { %5347 = vst [vmem:[#allocation17_spill] sm:$0xff] %v4946_v0  ;;  %v4950_v6 = vpop.f32.mrf.mxu1  ;;  %v937_v0 = vadd.f32 %v906_v37, %v786_v16 }
 0x166   : > { %5349 = vst [vmem:[#allocation19_spill] sm:$0xff] %v4950_v6  ;;  %v630_v6 = vadd.f32 %v629_v43, %v516_v29  ;;  %v938_v21 = vadd.f32 %v909_v40, %v787_v4  ;;  %v1093_v43 = vadd.f32 %v3930_v62, %v943_v23 }
 0x167   : > { %v1087_v18 = vadd.f32 %v1056_v28, %v937_v0 }
 0x168   : > { %v790_v42 = vadd.f32 %v771_v51, %v630_v6  ;;  %v1088_v11 = vadd.f32 %v1059_v60, %v938_v21  ;;  %v1243_v34 = vadd.f32 %v3954_v63, %v1093_v43 }
 0x169   : > { %v1237_v48 = vadd.f32 %v1206_v61, %v1087_v18 }
 0x16a   : > { %v941_v29 = vadd.f32 %v922_v56, %v790_v42  ;;  %v1238_v40 = vadd.f32 %v1209_v44, %v1088_v11  ;;  %v4960_v56 = vld [vmem:[%s5322_s3] ss:$0 sm:$0xff] }
 0x16c   : > { %v1091_v50 = vadd.f32 %v1072_v36, %v941_v29  ;;  %v5353_v61 = vld [vmem:[#allocation17_spill] sm:$0xff]  ;;  %v4966_v36 = vld [vmem:[%s5323_s4] ss:$0 sm:$0xff] }
 0x16d   : > { %v1092_v62 = vadd.f32 %v5353_v61, %v942_v30  ;;  %v5355_v14 = vld [vmem:[#allocation19_spill] sm:$0xff] }
 0x16e   : > { %v1241_v33 = vadd.f32 %v1222_v2, %v1091_v50 }
 0x16f   : > { %v1242_v16 = vadd.f32 %v5355_v14, %v1092_v62  ;;  %v5357_v62 = vld [vmem:[#allocation12_spill] sm:$0xff] }
 0x176   : > { %v3974_v1 = vpop.f32.mrf.mxu0 }
 0x177   : > { %v3998_v8 = vpop.f32.mrf.mxu1  ;;  %v1390_v31 = vadd.f32 %v3974_v1, %v1239_v32  ;;  %v5354_v1 = vld [vmem:[#allocation18_spill] sm:$0xff] }
 0x178   : > { %v1357_v3 = vpop.f32.mrf.mxu0 }
 0x179   : > { %v1507_v17 = vpop.f32.mrf.mxu1  ;;  %v1388_v37 = vadd.f32 %v1357_v3, %v1237_v48  ;;  %v1540_v55 = vadd.f32 %v3998_v8, %v1390_v31  ;;  %v1244_v3 = vadd.f32 %v5354_v1, %v1094_v52  ;;  %v4420_v1 = vld [vmem:[#allocation6 + $0xf0] sm:$0xff]  }
 0x17a   : > { %v3975_v5 = vpop.f32.mrf.mxu0 }
 0x17b   : > { %v3999_v41 = vpop.f32.mrf.mxu1  ;;  %v1391_v28 = vadd.f32 %v3975_v5, %v1240_v22  ;;  %v1538_v54 = vadd.f32 %v1507_v17, %v1388_v37 }
 0x17c   : > { %v1360_v9 = vpop.f32.mrf.mxu0 }
 0x17d   : > { %v1510_v10 = vpop.f32.mrf.mxu1  ;;  %v1389_v58 = vadd.f32 %v1360_v9, %v1238_v40  ;;  %v1541_v47 = vadd.f32 %v3999_v41, %v1391_v28 }
 0x17e   : > { %v3978_v19 = vpop.f32.mrf.mxu0 }
 0x17f   : > { %v4002_v49 = vpop.f32.mrf.mxu1  ;;  %v1394_v39 = vadd.f32 %v3978_v19, %v1243_v34  ;;  %v1539_v6 = vadd.f32 %v1510_v10, %v1389_v58  ;;  %v4419_v34 = vld [vmem:[#allocation6 + $0xb0] sm:$0xff]  }
 0x180   : > { %v1373_v15 = vpop.f32.mrf.mxu0 }
 0x181   : > { %v1523_v59 = vpop.f32.mrf.mxu1  ;;  %v1392_v4 = vadd.f32 %v1373_v15, %v1241_v33  ;;  %v1544_v17 = vadd.f32 %v4002_v49, %v1394_v39  ;;  %v5356_v33 = vmov 0.0  }
 0x182   : > { %v3979_v38 = vpop.f32.mrf.mxu0 }
 0x183   : > { %v4003_v8 = vpop.f32.mrf.mxu1  ;;  %v1395_v19 = vadd.f32 %v3979_v38, %v1244_v3  ;;  %v1542_v27 = vadd.f32 %v1523_v59, %v1392_v4  ;;  %v2046_v4 = vld [vmem:[#allocation2 + $0x2] sm:$0xff] }
 0x184   : > { %v1376_v51 = vpop.f32.mrf.mxu0 }
 0x185   : > { %v1393_v7 = vadd.f32 %v1376_v51, %v1242_v16  ;;  %v1526_v21 = vpop.f32.mrf.mxu1  ;;  %v1545_v23 = vadd.f32 %v4003_v8, %v1395_v19  ;;  %v5358_v8 = vld [vmem:[#allocation13_spill] sm:$0xff] }
 0x186   : > { %v4422_v16 = vld [vmem:[#allocation6 + $0xe8] sm:$0xff]  }
 0x187   : > { %v1543_v29 = vadd.f32 %v1526_v21, %v1393_v7  ;;  %v4426_v7 = vld [vmem:[#allocation6 + $0xd8] sm:$0xff]   ;;  %v4428_v21 = vld [vmem:[#allocation6 + $0xd0] sm:$0xff]  }
 0x196   : > { %v4022_v53 = vpop.f32.mrf.mxu0 }
 0x197   : > { %v1690_v60 = vadd.f32 %v4022_v53, %v1540_v55 }
 0x198   : > { %v1657_v44 = vpop.f32.mrf.mxu0 }
 0x199   : > { %v1705_v63 = vmul.f32 %v4960_v56, %v1690_v60  ;;  %v1688_v0 = vadd.f32 %v1657_v44, %v1538_v54  ;;  %v4421_v44 = vld [vmem:[#allocation6 + $0xa8] sm:$0xff]  }
 0x19a   : > { %v4023_v5 = vpop.f32.mrf.mxu0 }
 0x19b   : > { %v1720_v2 = vadd.f32 %v4966_v36, %v1705_v63  ;;  %v1703_v9 = vmul.f32 %v4960_v56, %v1688_v0  ;;  %v1691_v13 = vadd.f32 %v4023_v5, %v1541_v47 }
 0x19c   : > { %v1660_v24 = vpop.f32.mrf.mxu0 }
 0x19d   : > { %v4973_v41 = vmax.f32 %v1720_v2, 0.0  ;;  %v1718_v25 = vadd.f32 %v4966_v36, %v1703_v9  ;;  %v1706_v18 = vmul.f32 %v4960_v56, %v1691_v13  ;;  %v1689_v15 = vadd.f32 %v1660_v24, %v1539_v6  ;;  %v4423_v6 = vld [vmem:[#allocation6 + $0xa0] sm:$0xff]  }
 0x19e   : > { %v4026_v42 = vpop.f32.mrf.mxu0 }
 0x19f   : > { %1757 = vst [vmem:[#allocation2 + $0x31] sm:$0xff] %v4973_v41  ;;  %v4978_v32 = vmax.f32 %v1718_v25, 0.0  ;;  %v1721_v45 = vadd.f32 %v4966_v36, %v1706_v18  ;;  %v1704_v10 = vmul.f32 %v4960_v56, %v1689_v15  ;;  %v1694_v12 = vadd.f32 %v4026_v42, %v1544_v17  ;;  %v4425_v17 = vld [vmem:[#allocation6 + $0x98] sm:$0xff]   ;;  %v4424_v18 = vld [vmem:[#allocation6 + $0xe0] sm:$0xff]   ;;  %v4429_v42 = vld [vmem:[#allocation6 + $0x88] sm:$0xff]  }
 0x1a0   : > { %v1673_v26 = vpop.f32.mrf.mxu0 }
 0x1a1   : > { %1755 = vst [vmem:[#allocation2 + $0x11] sm:$0xff] %v4978_v32  ;;  %v4983_v38 = vmax.f32 %v1721_v45, 0.0  ;;  %v1719_v48 = vadd.f32 %v4966_v36, %v1704_v10  ;;  %v1709_v11 = vmul.f32 %v4960_v56, %v1694_v12  ;;  %v1692_v31 = vadd.f32 %v1673_v26, %v1542_v27  ;;  %v4427_v27 = vld [vmem:[#allocation6 + $0x90] sm:$0xff]   ;;  %v4431_v45 = vld [vmem:[#allocation6 + $0x80] sm:$0xff]   ;;  %v4430_v10 = vld [vmem:[#allocation6 + $0xc8] sm:$0xff]  }
 0x1a2   : > { %v4027_v20 = vpop.f32.mrf.mxu0  ;;  %v1799_v43 = vpack.c.bf16 %v4978_v32, %v1791_v35  ;;  %v4433_v12 = vld [vmem:[#allocation6 + $0x138] sm:$0xff]   ;;  %v4432_v26 = vld [vmem:[#allocation6 + $0xc0] sm:$0xff]  }
 0x1a3   : > { %1758 = vst [vmem:[#allocation2 + $0x41] sm:$0xff] %v4983_v38  ;;  %v4989_v22 = vmax.f32 %v1719_v48, 0.0  ;;  %v1724_v37 = vadd.f32 %v4966_v36, %v1709_v11  ;;  %v1707_v49 = vmul.f32 %v4960_v56, %v1692_v31  ;;  %v1695_v46 = vadd.f32 %v4027_v20, %v1545_v23  ;;  %v4435_v20 = vld [vmem:[#allocation6 + $0x130] sm:$0xff]  }
 0x1a4   : > { %v1676_v50 = vpop.f32.mrf.mxu0  ;;  %4044 = vmatprep.mubr.bf16.mxu1 %v1799_v43  ;;  %v2355_v51 = vpack.c.bf16 %v4983_v38, %v4973_v41  ;;  %v4434_v43 = vld [vmem:[#allocation6 + $0x178] sm:$0xff]  }
 0x1a5   : > { %1756 = vst [vmem:[#allocation2 + $0x21] sm:$0xff] %v4989_v22  ;;  %v4996_v40 = vmax.f32 %v1724_v37, 0.0  ;;  %v1722_v55 = vadd.f32 %v4966_v36, %v1707_v49  ;;  %v1710_v28 = vmul.f32 %v4960_v56, %v1695_v46  ;;  %v1693_v57 = vadd.f32 %v1676_v50, %v1543_v29  ;;  %v4437_v37 = vld [vmem:[#allocation6 + $0x128] sm:$0xff]   ;;  %v4436_v50 = vld [vmem:[#allocation6 + $0x170] sm:$0xff]  }
 0x1a6   : > { %v5002_v30 = vpack.c.bf16 %v4973_v41, %v4989_v22  ;;  %v5026_v63 = vld [vmem:[#allocation2 + $0x30] sm:$0xff]  ;;  %v4454_v41 = vld [vmem:[#allocation6 + $0x1e8] sm:$0xff]  }
 0x1a7   : > { %1761 = vst [vmem:[#allocation2 + $0x71] sm:$0xff] %v4996_v40  ;;  %v5005_v52 = vmax.f32 %v1722_v55, 0.0  ;;  %v1725_v53 = vadd.f32 %v4966_v36, %v1710_v28  ;;  %v1708_v54 = vmul.f32 %v4960_v56, %v1693_v57  ;;  %v5059_v48 = vld [vmem:[#allocation2 + $0x32] sm:$0xff] }
 0x1a8   : > { %v1764_v58 = vld [vmem:[#allocation2 + $0x10] sm:$0xff]  ;;  %4045 = vmatmul.mubr.bf16.vlgmr.msra.gmra.mxu1 %v5002_v30 }
 0x1a9   : > { %1759 = vst [vmem:[#allocation2 + $0x51] sm:$0xff] %v5005_v52  ;;  %v5011_v59 = vmax.f32 %v1725_v53, 0.0  ;;  %v1723_v60 = vadd.f32 %v4966_v36, %v1708_v54  ;;  %v1771_v61 = vpack.c.bf16 %v1764_v58, %v5356_v33  ;;  %4077 = vmatpush3.bf16.msra.mxu1 %v5357_v62  ;;  %v5018_v39 = vpack.c.bf16 %v5005_v52, %v4983_v38  ;;  %v5036_v5 = vld [vmem:[#allocation2 + $0x12] sm:$0xff]  ;;  %v4438_v54 = vld [vmem:[#allocation6 + $0x168] sm:$0xff]   ;;  %v4440_v62 = vld [vmem:[#allocation6 + $0x160] sm:$0xff]  }
 0x1aa   : > { %4078 = vmatprep.subr.bf16.mxu1 %v4419_v34  ;;  %v5040_v2 = vld [vmem:[#allocation2 + $0x40] sm:$0xff]  ;;  %v2054_v13 = vpack.c.bf16 %v5036_v5, %v2046_v4  ;;  %v2354_v53 = vpack.c.bf16 %v4989_v22, %v4978_v32  ;;  %v4443_v32 = vld [vmem:[#allocation6 + $0x110] sm:$0xff]   ;;  %v4442_v22 = vld [vmem:[#allocation6 + $0x158] sm:$0xff]  }
 0x1ab   : > { %1762 = vst [vmem:[#allocation2 + $0x81] sm:$0xff] %v5011_v59  ;;  %v5021_v56 = vmax.f32 %v1723_v60, 0.0  ;;  %4068 = vmatprep.mubr.bf16.mxu0 %v1771_v61  ;;  %4048 = vmatprep.mubr.bf16.mxu1 %v5018_v39  ;;  %v2357_v36 = vpack.c.bf16 %v5011_v59, %v4996_v40  ;;  %v5064_v31 = vld [vmem:[#allocation2 + $0x42] sm:$0xff]  ;;  %v2205_v46 = vpack.c.bf16 %v5040_v2, %v5026_v63  ;;  %v4441_v60 = vld [vmem:[#allocation6 + $0x118] sm:$0xff]  }
 0x1ac   : > { %v1765_v47 = vld [vmem:[#allocation2 + $0x20] sm:$0xff]  ;;  %v4446_v4 = vld [vmem:[#allocation6 + $0x148] sm:$0xff]  }
 0x1ad   : > { %1760 = vst [vmem:[#allocation2 + $0x61] sm:$0xff] %v5021_v56  ;;  %v5030_v0 = vpack.c.bf16 %v5026_v63, %v1765_v47  ;;  %4079 = vmatpush3.bf16.msra.mxu1 %v4419_v34  ;;  %v5034_v3 = vpack.c.bf16 %v4996_v40, %v5021_v56  ;;  %v2204_v15 = vpack.c.bf16 %v1765_v47, %v1764_v58  ;;  %v2048_v35 = vld [vmem:[#allocation2 + $0x22] sm:$0xff]  ;;  %v4444_v63 = vld [vmem:[#allocation6 + $0x150] sm:$0xff]   ;;  %v4458_v40 = vld [vmem:[#allocation6 + $0x1d8] sm:$0xff]  }
 0x1ae   : > { %4080 = vmatprep.subr.bf16.mxu1 %v4421_v44  ;;  %v5051_v24 = vld [vmem:[#allocation2 + $0x70] sm:$0xff]  ;;  %v5062_v11 = vpack.c.bf16 %v5059_v48, %v2048_v35  ;;  %v4439_v34 = vld [vmem:[#allocation6 + $0x120] sm:$0xff]   ;;  %v4445_v47 = vld [vmem:[#allocation6 + $0x108] sm:$0xff]  }
 0x1af   : > { %4069 = vmatmul.mubr.bf16.vlgmr.msra.gmra.mxu0 %v5030_v0  ;;  %v5077_v28 = vld [vmem:[#allocation2 + $0x72] sm:$0xff] }
 0x1b0   : > { %4101 = vmatpush3.bf16.msra.mxu0 %v5358_v8  ;;  %v5042_v9 = vld [vmem:[#allocation2 + $0x50] sm:$0xff]  ;;  %4049 = vmatmul.mubr.bf16.gmra.mxu1 %v5034_v3 }
 0x1b1   : > { %4102 = vmatprep.subr.bf16.mxu0 %v4420_v1  ;;  %v5048_v14 = vpack.c.bf16 %v5042_v9, %v5040_v2  ;;  %4081 = vmatpush3.bf16.msra.mxu1 %v4421_v44  ;;  %v5057_v23 = vld [vmem:[#allocation2 + $0x52] sm:$0xff]  ;;  %v2504_v44 = vpack.c.bf16 %v2048_v35, %v5036_v5  ;;  %v2356_v2 = vpack.c.bf16 %v5021_v56, %v5005_v52  ;;  %v4455_v52 = vld [vmem:[#allocation6 + $0x1a0] sm:$0xff]   ;;  %v4471_v35 = vld [vmem:[#allocation6 + $0x208] sm:$0xff]  }
 0x1b2   : > { %4092 = vmatprep.mubr.bf16.mxu1 %v2054_v13  ;;  %4082 = vmatprep.subr.bf16.mxu1 %v4423_v6  ;;  %v5068_v29 = vpack.c.bf16 %v5057_v23, %v5064_v31  ;;  %v5086_v58 = vld [vmem:[#allocation2 + $0x80] sm:$0xff]  ;;  %v4449_v5 = vld [vmem:[#allocation6 + $0x1b8] sm:$0xff]   ;;  %v4451_v8 = vld [vmem:[#allocation6 + $0x1b0] sm:$0xff]  }
 0x1b3   : > { %4072 = vmatprep.mubr.bf16.mxu0 %v5048_v14  ;;  %v2207_v61 = vpack.c.bf16 %v5086_v58, %v5051_v24  ;;  %v4453_v13 = vld [vmem:[#allocation6 + $0x1a8] sm:$0xff]  }
 0x1b4   : > { %4103 = vmatpush3.bf16.msra.mxu0 %v4420_v1  ;;  %v1769_v19 = vld [vmem:[#allocation2 + $0x60] sm:$0xff] }
 0x1b5   : > { %4104 = vmatprep.subr.bf16.mxu0 %v4422_v16  ;;  %v5054_v25 = vpack.c.bf16 %v5051_v24, %v1769_v19  ;;  %4083 = vmatpush3.bf16.msra.mxu1 %v4423_v6  ;;  %v5072_v49 = vld [vmem:[#allocation2 + $0x62] sm:$0xff]  ;;  %v2206_v55 = vpack.c.bf16 %v1769_v19, %v5042_v9  ;;  %v4450_v9 = vld [vmem:[#allocation6 + $0x1f8] sm:$0xff]  }
 0x1b6   : > { %4084 = vmatprep.subr.bf16.mxu1 %v4425_v17  ;;  %v5081_v57 = vpack.c.bf16 %v5077_v28, %v5072_v49  ;;  %v4447_v1 = vld [vmem:[#allocation6 + $0x100] sm:$0xff]   ;;  %v2506_v19 = vpack.c.bf16 %v5072_v49, %v5057_v23  ;;  %v4475_v49 = vld [vmem:[%s5326_s7 + $0x28] sm:$0xff]  }
 0x1b7   : > { %4073 = vmatmul.mubr.bf16.gmra.mxu0 %v5054_v25  ;;  %v4448_v6 = vld [vmem:[#allocation6 + $0x140] sm:$0xff]  }
 0x1b8   : > { %4105 = vmatpush3.bf16.msra.mxu0 %v4422_v16  ;;  %4116 = vmatprep.mubr.bf16.mxu0 %v2204_v15  ;;  %v2505_v16 = vpack.c.bf16 %v5064_v31, %v5059_v48  ;;  %v5103_v38 = vld [vmem:[#allocation2 + $0x82] sm:$0xff] }
 0x1b9   : > { %4106 = vmatprep.subr.bf16.mxu0 %v4424_v18  ;;  %4085 = vmatpush3.bf16.msra.mxu1 %v4425_v17  ;;  %v4452_v17 = vld [vmem:[#allocation6 + $0x1f0] sm:$0xff]   ;;  %v2507_v56 = vpack.c.bf16 %v5103_v38, %v5077_v28  ;;  %v4456_v24 = vld [vmem:[#allocation6 + $0x1e0] sm:$0xff]  }
 0x1ba   : > { %4086 = vmatprep.subr.bf16.mxu1 %v4427_v27  ;;  %v4463_v15 = vld [vmem:[#allocation6 + $0x180] sm:$0xff]  }
 0x1bb   : > { %v4472_v23 = vld [vmem:[#allocation6 + $0x200] sm:$0xff]  }
 0x1bc   : > { %4107 = vmatpush3.bf16.msra.mxu0 %v4424_v18  ;;  %v4459_v18 = vld [vmem:[#allocation6 + $0x190] sm:$0xff]  }
 0x1bd   : > { %4108 = vmatprep.subr.bf16.mxu0 %v4426_v7  ;;  %4087 = vmatpush3.bf16.msra.mxu1 %v4427_v27  ;;  %v4462_v27 = vld [vmem:[#allocation6 + $0x1c8] sm:$0xff]  }
 0x1be   : > { %4088 = vmatprep.subr.bf16.mxu1 %v4429_v42 }
 0x1c0   : > { %4109 = vmatpush3.bf16.msra.mxu0 %v4426_v7  ;;  %v4465_v7 = vld [vmem:[#allocation6 + $0x238] sm:$0xff]  }
 0x1c1   : > { %4110 = vmatprep.subr.bf16.mxu0 %v4428_v21  ;;  %4089 = vmatpush3.bf16.msra.mxu1 %v4429_v42  ;;  %v4466_v42 = vld [vmem:[#allocation6 + $0x230] sm:$0xff]  }
 0x1c2   : > { %4090 = vmatprep.subr.bf16.mxu1 %v4431_v45 }
 0x1c4   : > { %4111 = vmatpush3.bf16.msra.mxu0 %v4428_v21  ;;  %v4467_v21 = vld [vmem:[#allocation6 + $0x228] sm:$0xff]  }
 0x1c5   : > { %4112 = vmatprep.subr.bf16.mxu0 %v4430_v10  ;;  %4091 = vmatpush3.bf16.msra.mxu1 %v4431_v45  ;;  %v2658_v45 = vpack.c.bf16 %v5356_v33, %v5086_v58 }
 0x1c6   : > { %4124 = vmatprep.subr.bf16.mxu1 %v4433_v12 }
 0x1c8   : > { %4113 = vmatpush3.bf16.msra.mxu0 %v4430_v10  ;;  %4093 = vmatmul.mubr.bf16.vlgmr.msra.gmra.mxu1 %v5062_v11  ;;  %v4468_v10 = vld [vmem:[#allocation6 + $0x220] sm:$0xff]  }
 0x1c9   : > { %4114 = vmatprep.subr.bf16.mxu0 %v4432_v26  ;;  %4096 = vmatprep.mubr.bf16.mxu1 %v5068_v29 }
 0x1ca   : > { %4125 = vmatpush3.bf16.msra.mxu1 %v4433_v12 }
 0x1cb   : > { %4126 = vmatprep.subr.bf16.mxu1 %v4435_v20 }
 0x1cc   : > { %4115 = vmatpush3.bf16.msra.mxu0 %v4432_v26 }
 0x1cd   : > { %4148 = vmatprep.subr.bf16.mxu0 %v4434_v43 }
 0x1ce   : > { %4127 = vmatpush3.bf16.msra.mxu1 %v4435_v20  ;;  %v4474_v20 = vld [vmem:[%s5326_s7 + $0x30] sm:$0xff]  }
 0x1cf   : > { %4117 = vmatmul.mubr.bf16.vlgmr.msra.gmra.mxu0 %v2205_v46  ;;  %4128 = vmatprep.subr.bf16.mxu1 %v4437_v37 }
 0x1d0   : > { %4120 = vmatprep.mubr.bf16.mxu0 %v2206_v55  ;;  %4149 = vmatpush3.bf16.msra.mxu0 %v4434_v43  ;;  %v4476_v55 = vld [vmem:[%s5326_s7 + $0x20] sm:$0xff]  }
 0x1d1   : > { %4150 = vmatprep.subr.bf16.mxu0 %v4436_v50  ;;  %4097 = vmatmul.mubr.bf16.gmra.mxu1 %v5081_v57 }
 0x1d2   : > { %4129 = vmatpush3.bf16.msra.mxu1 %v4437_v37  ;;  %4140 = vmatprep.mubr.bf16.mxu1 %v2354_v53 }
 0x1d3   : > { %4130 = vmatprep.subr.bf16.mxu1 %v4439_v34 }
 0x1d4   : > { %4151 = vmatpush3.bf16.msra.mxu0 %v4436_v50 }
 0x1d5   : > { %4152 = vmatprep.subr.bf16.mxu0 %v4438_v54 }
 0x1d6   : > { %4131 = vmatpush3.bf16.msra.mxu1 %v4439_v34  ;;  %v4477_v34 = vld [vmem:[%s5326_s7 + $0x18] sm:$0xff]  }
 0x1d7   : > { %4121 = vmatmul.mubr.bf16.gmra.mxu0 %v2207_v61  ;;  %4132 = vmatprep.subr.bf16.mxu1 %v4441_v60  ;;  %v4479_v61 = vld [vmem:[%s5326_s7 + $0x8] sm:$0xff]  }
 0x1d8   : > { %4153 = vmatpush3.bf16.msra.mxu0 %v4438_v54  ;;  %4164 = vmatprep.mubr.bf16.mxu0 %v2504_v44  ;;  %v4478_v54 = vld [vmem:[%s5326_s7 + $0x10] sm:$0xff]  }
 0x1d9   : > { %4154 = vmatprep.subr.bf16.mxu0 %v4440_v62 }
 0x1da   : > { %4133 = vmatpush3.bf16.msra.mxu1 %v4441_v60 }
 0x1db   : > { %4134 = vmatprep.subr.bf16.mxu1 %v4443_v32 }
 0x1dc   : > { %4155 = vmatpush3.bf16.msra.mxu0 %v4440_v62 }
 0x1dd   : > { %4156 = vmatprep.subr.bf16.mxu0 %v4442_v22 }
 0x1de   : > { %4135 = vmatpush3.bf16.msra.mxu1 %v4443_v32  ;;  %v4480_v32 = vld [vmem:[%s5326_s7] sm:$0xff]  }
 0x1df   : > { %4136 = vmatprep.subr.bf16.mxu1 %v4445_v47 }
 0x1e0   : > { %4157 = vmatpush3.bf16.msra.mxu0 %v4442_v22 }
 0x1e1   : > { %4158 = vmatprep.subr.bf16.mxu0 %v4444_v63 }
 0x1e2   : > { %4137 = vmatpush3.bf16.msra.mxu1 %v4445_v47 }
 0x1e3   : > { %4138 = vmatprep.subr.bf16.mxu1 %v4447_v1 }
 0x1e4   : > { %4159 = vmatpush3.bf16.msra.mxu0 %v4444_v63 }
 0x1e5   : > { %4160 = vmatprep.subr.bf16.mxu0 %v4446_v4 }
 0x1e6   : > { %4139 = vmatpush3.bf16.msra.mxu1 %v4447_v1 }
 0x1e7   : > { %4172 = vmatprep.subr.bf16.mxu1 %v4449_v5 }
 0x1e8   : > { %4161 = vmatpush3.bf16.msra.mxu0 %v4446_v4 }
 0x1e9   : > { %4162 = vmatprep.subr.bf16.mxu0 %v4448_v6  ;;  %4141 = vmatmul.mubr.bf16.vlgmr.msra.gmra.mxu1 %v2355_v51  ;;  %v4457_v51 = vld [vmem:[#allocation6 + $0x198] sm:$0xff]  }
 0x1ea   : > { %4144 = vmatprep.mubr.bf16.mxu1 %v2356_v2  ;;  %4173 = vmatpush3.bf16.msra.mxu1 %v4449_v5 }
 0x1eb   : > { %4174 = vmatprep.subr.bf16.mxu1 %v4451_v8 }
 0x1ec   : > { %4163 = vmatpush3.bf16.msra.mxu0 %v4448_v6 }
 0x1ed   : > { %4196 = vmatprep.subr.bf16.mxu0 %v4450_v9 }
 0x1ee   : > { %4175 = vmatpush3.bf16.msra.mxu1 %v4451_v8 }
 0x1ef   : > { %4165 = vmatmul.mubr.bf16.vlgmr.msra.gmra.mxu0 %v2505_v16  ;;  %4176 = vmatprep.subr.bf16.mxu1 %v4453_v13 }
 0x1f0   : > { %4168 = vmatprep.mubr.bf16.mxu0 %v2506_v19  ;;  %4197 = vmatpush3.bf16.msra.mxu0 %v4450_v9 }
 0x1f1   : > { %4198 = vmatprep.subr.bf16.mxu0 %v4452_v17  ;;  %4145 = vmatmul.mubr.bf16.gmra.mxu1 %v2357_v36  ;;  %v4461_v36 = vld [vmem:[#allocation6 + $0x188] sm:$0xff]  }
 0x1f2   : > { %4177 = vmatpush3.bf16.msra.mxu1 %v4453_v13  ;;  %4188 = vmatprep.mubr.bf16.mxu1 %v5030_v0  ;;  %v4460_v0 = vld [vmem:[#allocation6 + $0x1d0] sm:$0xff]  }
 0x1f3   : > { %4178 = vmatprep.subr.bf16.mxu1 %v4455_v52 }
 0x1f4   : > { %4199 = vmatpush3.bf16.msra.mxu0 %v4452_v17 }
 0x1f5   : > { %4200 = vmatprep.subr.bf16.mxu0 %v4454_v41 }
 0x1f6   : > { %4179 = vmatpush3.bf16.msra.mxu1 %v4455_v52 }
 0x1f7   : > { %4169 = vmatmul.mubr.bf16.gmra.mxu0 %v2507_v56  ;;  %4180 = vmatprep.subr.bf16.mxu1 %v4457_v51 }
 0x1f8   : > { %4201 = vmatpush3.bf16.msra.mxu0 %v4454_v41  ;;  %4212 = vmatprep.mubr.bf16.mxu0 %v5002_v30  ;;  %v4464_v30 = vld [vmem:[#allocation6 + $0x1c0] sm:$0xff]  }
 0x1f9   : > { %4202 = vmatprep.subr.bf16.mxu0 %v4456_v24 }
 0x1fa   : > { %4181 = vmatpush3.bf16.msra.mxu1 %v4457_v51 }
 0x1fb   : > { %4182 = vmatprep.subr.bf16.mxu1 %v4459_v18 }
 0x1fc   : > { %4203 = vmatpush3.bf16.msra.mxu0 %v4456_v24 }
 0x1fd   : > { %4204 = vmatprep.subr.bf16.mxu0 %v4458_v40 }
 0x1fe   : > { %4183 = vmatpush3.bf16.msra.mxu1 %v4459_v18 }
 0x1ff   : > { %4184 = vmatprep.subr.bf16.mxu1 %v4461_v36 }
 0x200   : > { %4205 = vmatpush3.bf16.msra.mxu0 %v4458_v40 }
 0x201   : > { %4206 = vmatprep.subr.bf16.mxu0 %v4460_v0 }
 0x202   : > { %4185 = vmatpush3.bf16.msra.mxu1 %v4461_v36 }
 0x203   : > { %4186 = vmatprep.subr.bf16.mxu1 %v4463_v15 }
 0x204   : > { %4207 = vmatpush3.bf16.msra.mxu0 %v4460_v0 }
 0x205   : > { %4208 = vmatprep.subr.bf16.mxu0 %v4462_v27 }
 0x206   : > { %4187 = vmatpush3.bf16.msra.mxu1 %v4463_v15 }
 0x207   : > { %4220 = vmatprep.subr.bf16.mxu1 %v4465_v7 }
 0x208   : > { %4209 = vmatpush3.bf16.msra.mxu0 %v4462_v27 }
 0x209   : > { %4210 = vmatprep.subr.bf16.mxu0 %v4464_v30  ;;  %4189 = vmatmul.mubr.bf16.vlgmr.msra.gmra.mxu1 %v5048_v14  ;;  %v2804_v14 = vld [vmem:[#allocation2 + $0x91] sm:$0xff] }
 0x20a   : > { %4192 = vmatprep.mubr.bf16.mxu1 %v5054_v25  ;;  %4221 = vmatpush3.bf16.msra.mxu1 %v4465_v7  ;;  %v4469_v25 = vld [vmem:[#allocation6 + $0x218] sm:$0xff]   ;;  %v2808_v12 = vpack.c.bf16 %v2804_v14, %v5011_v59 }
 0x20b   : > { %4222 = vmatprep.subr.bf16.mxu1 %v4466_v42 }
 0x20c   : > { %4211 = vmatpush3.bf16.msra.mxu0 %v4464_v30 }
 0x20d   : > { %4244 = vmatprep.subr.bf16.mxu0 %v5356_v33 }
 0x20e   : > { %4223 = vmatpush3.bf16.msra.mxu1 %v4466_v42 }
 0x20f   : > { %4213 = vmatmul.mubr.bf16.vlgmr.msra.gmra.mxu0 %v5018_v39  ;;  %4224 = vmatprep.subr.bf16.mxu1 %v4467_v21  ;;  %v4470_v39 = vld [vmem:[#allocation6 + $0x210] sm:$0xff]  }
 0x210   : > { %4216 = vmatprep.mubr.bf16.mxu0 %v5034_v3  ;;  %v2954_v3 = vld [vmem:[#allocation2 + $0x92] sm:$0xff] }
 0x211   : > { %4193 = vmatmul.mubr.bf16.gmra.mxu1 %v2658_v45  ;;  %v2958_v59 = vpack.c.bf16 %v2954_v3, %v5103_v38 }
 0x212   : > { %4225 = vmatpush3.bf16.msra.mxu1 %v4467_v21  ;;  %4236 = vmatprep.mubr.bf16.mxu1 %v5062_v11  ;;  %v4473_v11 = vld [vmem:[%s5326_s7 + $0x38] sm:$0xff]  }
 0x213   : > { %4226 = vmatprep.subr.bf16.mxu1 %v4468_v10  ;;  %4245 = vmatpush3.bf16.msra.mxu0 %v4473_v11 }
 0x214   : > { %4246 = vmatprep.subr.bf16.mxu0 %v5356_v33 }
 0x216   : > { %4227 = vmatpush3.bf16.msra.mxu1 %v4468_v10 }
 0x217   : > { %4217 = vmatmul.mubr.bf16.gmra.mxu0 %v2808_v12  ;;  %4228 = vmatprep.subr.bf16.mxu1 %v4469_v25 }
 0x218   : > { %4247 = vmatpush3.bf16.msra.mxu0 %v4474_v20  ;;  %4260 = vmatprep.mubr.msk.bf16.mxu0 %vm4608_vm0, %v5356_v33 }
 0x219   : > { %4248 = vmatprep.subr.bf16.mxu0 %v5356_v33 }
 0x21a   : > { %4229 = vmatpush3.bf16.msra.mxu1 %v4469_v25 }
 0x21b   : > { %4230 = vmatprep.subr.bf16.mxu1 %v4470_v39 }
 0x21c   : > { %4249 = vmatpush3.bf16.msra.mxu0 %v4475_v49 }
 0x21d   : > { %4250 = vmatprep.subr.bf16.mxu0 %v5356_v33 }
 0x21e   : > { %4231 = vmatpush3.bf16.msra.mxu1 %v4470_v39 }
 0x21f   : > { %4232 = vmatprep.subr.bf16.mxu1 %v4471_v35 }
 0x220   : > { %4251 = vmatpush3.bf16.msra.mxu0 %v4476_v55 }
 0x221   : > { %4252 = vmatprep.subr.bf16.mxu0 %v5356_v33 }
 0x222   : > { %4233 = vmatpush3.bf16.msra.mxu1 %v4471_v35 }
 0x223   : > { %4234 = vmatprep.subr.bf16.mxu1 %v4472_v23 }
 0x224   : > { %4253 = vmatpush3.bf16.msra.mxu0 %v4477_v34 }
 0x225   : > { %4254 = vmatprep.subr.bf16.mxu0 %v5356_v33 }
 0x226   : > { %4235 = vmatpush3.bf16.msra.mxu1 %v4472_v23 }
 0x228   : > { %4255 = vmatpush3.bf16.msra.mxu0 %v4478_v54 }
 0x229   : > { %4237 = vmatmul.mubr.bf16.vlgmr.msra.gmra.mxu1 %v5068_v29  ;;  %4256 = vmatprep.subr.bf16.mxu0 %v5356_v33 }
 0x22a   : > { %4240 = vmatprep.mubr.bf16.mxu1 %v5081_v57 }
 0x22c   : > { %4257 = vmatpush3.bf16.msra.mxu0 %v4479_v61 }
 0x22d   : > { %4258 = vmatprep.subr.bf16.mxu0 %v5356_v33 }
 0x230   : > { %4259 = vmatpush3.bf16.msra.mxu0 %v4480_v32 }
 0x231   : > { %4241 = vmatmul.mubr.bf16.gmra.mxu1 %v2958_v59 }
 0x268   : > { %v5121_v26 = vpop.f32.mrf.mxu1 }
 0x26a   : > { %v5123_v48 = vpop.f32.mrf.mxu1 }
 0x26c   : > { %v5128_v31 = vpop.f32.mrf.mxu1 }
 0x26e   : > { %v5136_v43 = vpop.f32.mrf.mxu1 }
 0x26f   : > { %v5131_v29 = vpop.f32.mrf.mxu0 }
 0x270   : > { %v5144_v46 = vpop.f32.mrf.mxu1  ;;  %v2024_v59 = vadd.f32 %v5131_v29, %v5121_v26 }
 0x271   : > { %v5139_v37 = vpop.f32.mrf.mxu0 }
 0x272   : > { %v5152_v28 = vpop.f32.mrf.mxu1  ;;  %v2016_v11 = vadd.f32 %v5139_v37, %v5123_v48 }
 0x273   : > { %v5147_v50 = vpop.f32.mrf.mxu0 }
 0x274   : > { %v5160_v53 = vpop.f32.mrf.mxu1  ;;  %v2027_v34 = vadd.f32 %v5147_v50, %v5128_v31 }
 0x275   : > { %v5155_v57 = vpop.f32.mrf.mxu0 }
 0x276   : > { %v5169_v60 = vpop.f32.mrf.mxu1  ;;  %v2019_v32 = vadd.f32 %v5155_v57, %v5136_v43 }
 0x277   : > { %v5167_v58 = vpop.f32.mrf.mxu0 }
 0x279   : > { %v5175_v44 = vpop.f32.mrf.mxu0 }
 0x27a   : > { %v2032_v31 = vadd.f32 %v5175_v44, %v5152_v28 }
 0x27b   : > { %v5181_v47 = vpop.f32.mrf.mxu0 }
 0x27d   : > { %v5183_v1 = vpop.f32.mrf.mxu0 }
 0x288   : > { %v4094_v62 = vpop.f32.mrf.mxu1 }
 0x289   : > { %v2190_v20 = vadd.f32 %v4094_v62, %v2024_v59  ;;  %v2040_v59 = vadd.f32 %v5167_v58, %v5144_v46  ;;  %v2035_v46 = vadd.f32 %v5183_v1, %v5169_v60 }
 0x28a   : > { %v2157_v22 = vpop.f32.mrf.mxu1 }
 0x28b   : > { %v2188_v61 = vadd.f32 %v2157_v22, %v2016_v11 }
 0x28c   : > { %v4095_v63 = vpop.f32.mrf.mxu1 }
 0x28e   : > { %v2160_v5 = vpop.f32.mrf.mxu1 }
 0x28f   : > { %v4118_v4 = vpop.f32.mrf.mxu0  ;;  %v2189_v48 = vadd.f32 %v2160_v5, %v2019_v32 }
 0x290   : > { %v2340_v54 = vadd.f32 %v4118_v4, %v2190_v20 }
 0x291   : > { %v2307_v6 = vpop.f32.mrf.mxu0  ;;  %v4098_v8 = vpop.f32.mrf.mxu1 }
 0x293   : > { %v4119_v2 = vpop.f32.mrf.mxu0  ;;  %v2173_v9 = vpop.f32.mrf.mxu1 }
 0x295   : > { %v2310_v13 = vpop.f32.mrf.mxu0  ;;  %v5185_v16 = vpop.f32.mrf.mxu1 }
 0x296   : > { %v2339_v50 = vadd.f32 %v2310_v13, %v2189_v48 }
 0x297   : > { %v4122_v17 = vpop.f32.mrf.mxu0  ;;  %v5187_v19 = vpop.f32.mrf.mxu1 }
 0x299   : > { %v2323_v33 = vpop.f32.mrf.mxu0 }
 0x29b   : > { %v5189_v38 = vpop.f32.mrf.mxu0 }
 0x29d   : > { %v5191_v56 = vpop.f32.mrf.mxu0 }
 0x2a9   : > { %v4142_v52 = vpop.f32.mrf.mxu1 }
 0x2ab   : > { %v2457_v41 = vpop.f32.mrf.mxu1 }
 0x2ad   : > { %v4143_v51 = vpop.f32.mrf.mxu1 }
 0x2af   : > { %v4166_v24 = vpop.f32.mrf.mxu0  ;;  %v2460_v18 = vpop.f32.mrf.mxu1 }
 0x2b1   : > { %v2607_v40 = vpop.f32.mrf.mxu0  ;;  %v5193_v36 = vpop.f32.mrf.mxu1 }
 0x2b3   : > { %v4167_v0 = vpop.f32.mrf.mxu0  ;;  %v5195_v15 = vpop.f32.mrf.mxu1 }
 0x2b5   : > { %v2610_v27 = vpop.f32.mrf.mxu0  ;;  %v5197_v7 = vpop.f32.mrf.mxu1 }
 0x2b7   : > { %v5199_v30 = vpop.f32.mrf.mxu0  ;;  %v5201_v42 = vpop.f32.mrf.mxu1 }
 0x2b8   : > { %5359 = vst [vmem:[#allocation14_spill] sm:$0xff] %v5201_v42  ;;  %v2490_v42 = vadd.f32 %v4142_v52, %v2340_v54  ;;  %v2192_v52 = vadd.f32 %v2173_v9, %v2032_v31  ;;  %v2193_v9 = vadd.f32 %v5187_v19, %v2035_v46 }
 0x2b9   : > { %v5203_v45 = vpop.f32.mrf.mxu0 }
 0x2ba   : > { %v2640_v37 = vadd.f32 %v4166_v24, %v2490_v42  ;;  %v2489_v24 = vadd.f32 %v2460_v18, %v2339_v50  ;;  %v2342_v28 = vadd.f32 %v2323_v33, %v2192_v52 }
 0x2bb   : > { %v5205_v14 = vpop.f32.mrf.mxu0 }
 0x2bc   : > { %5360 = vst [vmem:[#allocation15_spill] sm:$0xff] %v5205_v14 }
 0x2bd   : > { %v5207_v12 = vpop.f32.mrf.mxu0 }
 0x2be   : > { %5361 = vst [vmem:[#allocation16_spill] sm:$0xff] %v5207_v12  ;;  %v2338_v12 = vadd.f32 %v2307_v6, %v2188_v61  ;;  %v2194_v6 = vadd.f32 %v4098_v8, %v2040_v59 }
 0x2bf   : > { %v5364_v11 = vld [vmem:[#allocation14_spill] sm:$0xff] }
 0x2c0   : > { %v2488_v62 = vadd.f32 %v2457_v41, %v2338_v12  ;;  %v2344_v58 = vadd.f32 %v4122_v17, %v2194_v6  ;;  %v3567_v6 = vld [vmem:[%s4754_s27 + $0x21] sm:$0xff] }
 0x2c2   : > { %v2638_v22 = vadd.f32 %v2607_v40, %v2488_v62  ;;  %v2494_v60 = vadd.f32 %v5193_v36, %v2344_v58 }
 0x2c5   : > { %v5366_v32 = vld [vmem:[#allocation16_spill] sm:$0xff] }
 0x2c9   : > { %v4190_v21 = vpop.f32.mrf.mxu1 }
 0x2ca   : > { %v2791_v43 = vadd.f32 %v4190_v21, %v2640_v37 }
 0x2cb   : > { %v2758_v10 = vpop.f32.mrf.mxu1 }
 0x2cc   : > { %v2789_v42 = vadd.f32 %v2758_v10, %v2638_v22  ;;  %v3568_v22 = vld [vmem:[%s4754_s27 + $0x31] sm:$0xff] }
 0x2cd   : > { %v4191_v25 = vpop.f32.mrf.mxu1 }
 0x2cf   : > { %v4214_v39 = vpop.f32.mrf.mxu0  ;;  %v2761_v35 = vpop.f32.mrf.mxu1 }
 0x2d0   : > { %v2941_v41 = vadd.f32 %v4214_v39, %v2791_v43 }
 0x2d1   : > { %v2908_v23 = vpop.f32.mrf.mxu0  ;;  %v5209_v3 = vpop.f32.mrf.mxu1 }
 0x2d2   : > { %5362 = vst [vmem:[#allocation17_spill] sm:$0xff] %v5209_v3  ;;  %v2191_v3 = vadd.f32 %v4095_v63, %v2027_v34  ;;  %v2043_v63 = vadd.f32 %v5181_v47, %v5160_v53  ;;  %v2939_v40 = vadd.f32 %v2908_v23, %v2789_v42  ;;  %v5235_v47 = vld [vmem:[%s5324_s5] ss:$0 sm:$0xff] }
 0x2d3   : > { %v4215_v49 = vpop.f32.mrf.mxu0  ;;  %v5215_v55 = vpop.f32.mrf.mxu1 }
 0x2d4   : > { %v2341_v29 = vadd.f32 %v4119_v2, %v2191_v3  ;;  %v2195_v44 = vadd.f32 %v5185_v16, %v2043_v63  ;;  %v2492_v16 = vadd.f32 %v5195_v15, %v2342_v28  ;;  %v3575_v15 = vld [vmem:[%s5325_s6] ss:$0 sm:$0xff] }
 0x2d5   : > { %v2911_v14 = vpop.f32.mrf.mxu0  ;;  %v5221_v26 = vpop.f32.mrf.mxu1 }
 0x2d6   : > { %v2491_v4 = vadd.f32 %v4143_v51, %v2341_v29  ;;  %v2639_v51 = vadd.f32 %v2610_v27, %v2489_v24  ;;  %v2345_v8 = vadd.f32 %v5189_v38, %v2195_v44  ;;  %v2644_v27 = vadd.f32 %v5199_v30, %v2494_v60 }
 0x2d7   : > { %v4218_v57 = vpop.f32.mrf.mxu0  ;;  %v2777_v2 = vpop.f32.mrf.mxu1  ;;  %v2642_v19 = vadd.f32 %v5203_v45, %v2492_v16  ;;  %v3566_v45 = vld [vmem:[%s4754_s27 + $0x11] sm:$0xff] }
 0x2d8   : > { %v2641_v5 = vadd.f32 %v4167_v0, %v2491_v4  ;;  %v2790_v33 = vadd.f32 %v2761_v35, %v2639_v51  ;;  %v2343_v0 = vadd.f32 %v5191_v56, %v2193_v9  ;;  %v2495_v10 = vadd.f32 %v5197_v7, %v2345_v8  ;;  %v5363_v56 = vld [vmem:[#allocation15_spill] sm:$0xff] }
 0x2d9   : > { %v2924_v12 = vpop.f32.mrf.mxu0  ;;  %v5365_v7 = vld [vmem:[#allocation17_spill] sm:$0xff]  ;;  %v2793_v34 = vadd.f32 %v5215_v55, %v2642_v19 }
 0x2da   : > { %v2792_v21 = vadd.f32 %v4191_v25, %v2641_v5  ;;  %v2940_v39 = vadd.f32 %v2911_v14, %v2790_v33  ;;  %v2645_v3 = vadd.f32 %v5363_v56, %v2495_v10  ;;  %v2493_v30 = vadd.f32 %v5364_v11, %v2343_v0  ;;  %v3572_v0 = vld [vmem:[%s4754_s27 + $0x71] sm:$0xff] }
 0x2db   : > { %v4219_v36 = vpop.f32.mrf.mxu0  ;;  %v2795_v20 = vadd.f32 %v5365_v7, %v2644_v27  ;;  %v2943_v59 = vadd.f32 %v2924_v12, %v2793_v34  ;;  %v3571_v27 = vld [vmem:[%s4754_s27 + $0x61] sm:$0xff] }
 0x2dc   : > { %v2942_v17 = vadd.f32 %v4215_v49, %v2792_v21  ;;  %v2643_v29 = vadd.f32 %v5366_v32, %v2493_v30  ;;  %v2796_v31 = vadd.f32 %v5221_v26, %v2645_v3  ;;  %v3570_v21 = vld [vmem:[%s4754_s27 + $0x51] sm:$0xff] }
 0x2dd   : > { %v2945_v48 = vadd.f32 %v4218_v57, %v2795_v20  ;;  %v2927_v50 = vpop.f32.mrf.mxu0 }
 0x2de   : > { %v2794_v55 = vadd.f32 %v2777_v2, %v2643_v29  ;;  %v2946_v24 = vadd.f32 %v4219_v36, %v2796_v31 }
 0x2e0   : > { %v2944_v46 = vadd.f32 %v2927_v50, %v2794_v55 }
 0x2e9   : > { %v4238_v13 = vpop.f32.mrf.mxu1 }
 0x2ea   : > { %v3091_v53 = vadd.f32 %v4238_v13, %v2941_v41  ;;  %v3569_v41 = vld [vmem:[%s4754_s27 + $0x41] sm:$0xff] }
 0x2eb   : > { %v3058_v1 = vpop.f32.mrf.mxu1 }
 0x2ec   : > { %v3089_v18 = vadd.f32 %v3058_v1, %v2939_v40  ;;  %v3114_v25 = vmul.f32 %v5235_v47, %v3091_v53 }
 0x2ed   : > { %v4239_v38 = vpop.f32.mrf.mxu1 }
 0x2ee   : > { %v3112_v35 = vmul.f32 %v5235_v47, %v3089_v18  ;;  %v3092_v23 = vadd.f32 %v4239_v38, %v2942_v17  ;;  %v3129_v37 = vadd.f32 %v3575_v15, %v3114_v25 }
 0x2ef   : > { %v3061_v49 = vpop.f32.mrf.mxu1 }
 0x2f0   : > { %v3127_v14 = vadd.f32 %v3575_v15, %v3112_v35  ;;  %v3115_v54 = vmul.f32 %v5235_v47, %v3092_v23  ;;  %v3090_v61 = vadd.f32 %v3061_v49, %v2940_v39  ;;  %v3137_v58 = vadd.f32 %v3568_v22, %v3129_v37  ;;  %v3573_v39 = vld [vmem:[%s4754_s27 + $0x81] sm:$0xff]  ;;  %s353_s27 = sand.u32 1, %s4593_s10   ;;  %v3183_v37 = vld [vmem:[%s5327_s8] sm:$0x1] }
 0x2f1   : > { %v4242_v62 = vpop.f32.mrf.mxu1  ;;  %s354_s22 = scalar_lea.vmem [#allocation8], %s353_s27  ;;  %s3274_s26 = scalar_lea.sflag [#allocation5], %s353_s27 }
 0x2f2   : > { %v3113_v4 = vmul.f32 %v5235_v47, %v3090_v61  ;;  %v3135_v43 = vadd.f32 %v3566_v45, %v3127_v14  ;;  %v3130_v63 = vadd.f32 %v3575_v15, %v3115_v54  ;;  %v3095_v52 = vadd.f32 %v4242_v62, %v2945_v48  ;;  %s3286_s25 = sshll.u32 %s354_s22, 4  ;;  %s5280_s25 = int_to_ptr.vmem [resolvable:$true] %s3286_s25 }
 0x2f3   : > { %v3074_v5 = vpop.f32.mrf.mxu1  ;;  %v3145_v1 = vmax.f32 %v3137_v58, 0.0  ;;  %s4533_s28 = scalar_lea.vmem %s5280_s25, 16  ;;  %p4540_p11 = scmp.lt.s32.totalorder %s5280_s25, %s4538_s29 }
 0x2f4   : > { %v3128_v42 = vadd.f32 %v3575_v15, %v3113_v4  ;;  %v3093_v57 = vadd.f32 %v3074_v5, %v2943_v59  ;;  %v3118_v26 = vmul.f32 %v5235_v47, %v3095_v52  ;;  %v3143_v51 = vmax.f32 %v3135_v43, 0.0  ;;  %p4534_p10 = scmp.ne.s32.totalorder %s5280_s25, %s4533_s28  ;;  %p4541_p0 = scmp.lt.s32.totalorder %s4539_s14, %s4533_s28 }
 0x2f5   : > { %v4243_v28 = vpop.f32.mrf.mxu1  ;;  %v3138_v40 = vadd.f32 %v3569_v41, %v3130_v63 }
 0x2f6   : > { %v3136_v44 = vadd.f32 %v3567_v6, %v3128_v42  ;;  %v3116_v13 = vmul.f32 %v5235_v47, %v3093_v57  ;;  %v3096_v2 = vadd.f32 %v4243_v28, %v2946_v24  ;;  %v3133_v17 = vadd.f32 %v3575_v15, %v3118_v26  ;;  %p4535_p12 = pnand %p4534_p10, %p4698_p5  ;;  %p4542_p1 = por %p4541_p0, %p4540_p11 }
 0x2f7   : > { %v3077_v12 = vpop.f32.mrf.mxu1  ;;  %v3146_v10 = vmax.f32 %v3138_v40, 0.0 }
 0x2f8   : > { %v3144_v53 = vmax.f32 %v3136_v44, 0.0  ;;  %v3131_v8 = vadd.f32 %v3575_v15, %v3116_v13  ;;  %v3119_v9 = vmul.f32 %v5235_v47, %v3096_v2  ;;  %v3094_v60 = vadd.f32 %v3077_v12, %v2944_v46  ;;  %p4536_p8 = pneg %p4535_p12 }
 0x2f9   : > { %v3141_v36 = vadd.f32 %v3572_v0, %v3133_v17 }
 0x2fa   : > { %v3151_v16 = vadd.f32 %v3144_v53, %v3143_v51  ;;  %v3139_v33 = vadd.f32 %v3570_v21, %v3131_v8  ;;  %v3117_v18 = vmul.f32 %v5235_v47, %v3094_v60  ;;  %v3134_v38 = vadd.f32 %v3575_v15, %v3119_v9  ;;  %p4543_p3 = pnand %p4542_p1, %p4536_p8 }
 0x2fb   : > { %v3149_v7 = vmax.f32 %v3141_v36, 0.0 }
 0x2fc   : > { %v3152_v25 = vadd.f32 %v3151_v16, %v3145_v1  ;;  %v3132_v19 = vadd.f32 %v3575_v15, %v3117_v18  ;;  %v3147_v35 = vmax.f32 %v3139_v33, 0.0  ;;  %v3142_v11 = vadd.f32 %v3573_v39, %v3134_v38 }
 0x2fe   : > { %v3153_v23 = vadd.f32 %v3152_v25, %v3146_v10  ;;  %v3140_v56 = vadd.f32 %v3571_v27, %v3132_v19  ;;  %v3150_v49 = vmax.f32 %v3142_v11, 0.0 }
 0x300   : > { %v3154_v3 = vadd.f32 %v3153_v23, %v3147_v35  ;;  %v3148_v30 = vmax.f32 %v3140_v56, 0.0 }
 0x302   : > { %v3155_v20 = vadd.f32 %v3154_v3, %v3148_v30 }
 0x304   : > { %v3156_v47 = vadd.f32 %v3155_v20, %v3149_v7 }
 0x306   : > { %v3157_v34 = vadd.f32 %v3156_v47, %v3150_v49 }
 0x308   : > { %v3158_v45 = vrot.slane %v3157_v34, 4 }
 0x30a   : > { %v3159_v14 = vadd.f32 %v3158_v45, %v3157_v34 }
 0x30c   : > { %v3160_v54 = vrot.slane %v3159_v14, 2 }
 0x30e   : > { %v3161_v61 = vadd.f32 %v3160_v54, %v3159_v14 }
 0x310   : > { %v3162_v15 = vrot.slane %v3161_v61, 1 }
 0x312   : > { %v3163_v32 = vadd.f32 %v3162_v15, %v3161_v61 }
 0x314   : > { %v3165_v29 = vmul.f32 0.015625, %v3163_v32 }
 0x316   : > { %v3166_v48 = vpack.c.bf16 %v3165_v29, %v3165_v29 }
 0x318   : > { %4261 = vmatmul.mubr.bf16.vlgmr.msra.gmra.mxu0 %v3166_v48 }
 0x3d8   : > { %v3266_v62 = vpop.f32.mrf.mxu0 }
 0x3d9   : > { %v3267_v59 = vadd.f32 %v3266_v62, %v3183_v37 }
 0x3da   : > { %v4262_v31 = vpop.f32.mrf.mxu0 }
 0x3db   : > { %3272 = vst [vmem:[%s354_s22] sm:$0x1] %v3267_v59 }
 0x3dc   : > { %v3269_v50 = vpop.f32.mrf.mxu0 }
 0x3dd   : > { %4546 = shalt.err (!%p4543_p3)
}
 0x3de   : > { %s4547_s16 = scalar_lea.hbm %s5278_s24, 16  ;;  %s4551_s22 = scalar_lea.hbm %s5328_s9, 32 }
 0x3df   : > { %p4548_p2 = scmp.ne.s32.totalorder %s5278_s24, %s4547_s16  ;;  %p4552_p7 = scmp.lt.s32.totalorder %s5278_s24, %s5328_s9 }
 0x3e0   : > { %p4553_p6 = scmp.lt.s32.totalorder %s4551_s22, %s4547_s16 }
 0x3e1   : > { %p4549_p4 = pnand %p4548_p2, %p4698_p5 }
 0x3e2   : > { %p4554_p9 = por %p4553_p6, %p4552_p7 }
 0x3e3   : > { %p4550_p13 = pneg %p4549_p4 }
 0x3e5   : > { %p4555_p10 = pnand %p4554_p9, %p4550_p13 }
 0x3e7   : > { %4558 = shalt.err (!%p4555_p10)
}
 0x3e8   : > { %4273 = dma.vmem_to_hbm [thread:$0]  (%p4698_p5), %s5280_s25, 16, %s5278_s24, %s3274_s26   ;;  %v4263_v22 = vpop.f32.mrf.mxu0 }
 0x3e9 PF: > { %p4290_p12 = scmp.ge.s32.totalorder %s4601_s12, 2  ;;  %s3298_s28 = sand.u32 1, %s4589_s30  }
 0x3ea   : > { %p5367_p8 = scmp.ne.s32.totalorder %s5335_s20, 0  ;;  %s3299_s13 = scalar_lea.sflag [#allocation5], %s3298_s28 }
 0x3ec   : > { %p4283_p11 = pnand %p4290_p12, %p5367_p8 }
 0x3ee   : > { %p4284_p0 = pneg %p4283_p11 }
 0x3f0   : > { %4584 = dma.done.wait (%p4284_p0), %s3299_s13, 16  }
 0x3f1   : > { %4586 = vsyncadd (%p4284_p0), %s3299_s13, 4294967280  ;;  %p21_p1 = scmp.ge.s32.totalorder %s4685_s15, 4   ;;  %s5368_s30 = smov %s4593_s10 }
 0x3f2   : > { %s5369_s10 = smov %s4597_s11  ;;  %s5370_s11 = smov %s4696_s18 }
 0x3f3   : > { %s5371_s12 = smov %s4685_s15  ;;  %23 = sbr.rel (!%p21_p1) target bundleno = 5 (0x5), region = 120 }
 0x3f8   :  { %3303 = vsyncpa [#allocation4], 1 }
 0x3f9   :  { %3305 = vsyncpa [#allocation4 + $0x1], 1 }
 0x3fa   :  { %3306 = vsyncpa [#allocation7], 1 }
 0x3fb   :  { %3307 = vsyncpa [#allocation5], 1 }
 0x3fc   :  { %3309 = vsyncpa [#allocation5 + $0x1], 1 }

</bundles_post_ra>
